<compile_context>
chip_gen: v6e
topology: v6e:2x2x1
jax: 0.10.0
libtpu: 0.0.40
codegen_flags: <defaults>
</compile_context>

<pallas_src>
import functools

import jax
import jax.numpy as jnp
from jax.experimental import pallas as pl
from jax.experimental.pallas import tpu as pltpu


def _round_up(x: int, m: int) -> int:
    return (x + m - 1) // m * m


def _make_kernel(batch_p: int, seq_len: int, hidden_size: int):
    Bp, T, H = batch_p, seq_len, hidden_size

    def kernel(x_ref,                        # (T*Bp, D)  time-major rows: row t*Bp + b == x[b, t]
               wih0_ref, whh0_ref, b0_ref,   # layer 0: (D,4H), (H,4H), (1,4H)
               wih1_ref, whh1_ref, b1_ref,   # layer 1: (H,4H), (H,4H), (1,4H)
               wfc_ref, bfc_ref,             # fc:      (H,O),  (1,O)
               out_ref,                      # (Bp, O)
               gih0_ref):                    # VMEM scratch (T*Bp, 4H) f32
        # ---- Hoisted, non-recurrent layer-0 input projection: one big MXU matmul ----
        gih0_ref[...] = (
            jnp.dot(x_ref[...], wih0_ref[...], preferred_element_type=jnp.float32)
            + b0_ref[...])

        # Load recurrent weights / biases once (hoisted out of the time loop).
        whh0 = whh0_ref[...]
        wih1 = wih1_ref[...]
        whh1 = whh1_ref[...]
        b1 = b1_ref[...]

        def activate(gates, c):
            # PyTorch gate order: i, f, g, o.
            i = jax.nn.sigmoid(gates[:, 0 * H:1 * H])
            f = jax.nn.sigmoid(gates[:, 1 * H:2 * H])
            g = jnp.tanh(gates[:, 2 * H:3 * H])
            o = jax.nn.sigmoid(gates[:, 3 * H:4 * H])
            c_new = f * c + i * g
            h_new = o * jnp.tanh(c_new)
            return h_new, c_new

        def step(t, carry):
            h1, c1, h2, c2 = carry
            # Layer-1 recurrent part: depends only on t-1 state, so it can be
            # scheduled to overlap with the layer-0 work below.
            g1_rec = jnp.dot(h2, whh1, preferred_element_type=jnp.float32) + b1
            # Layer 0: precomputed x-projection (sublane-aligned slice for step t)
            # plus the recurrent projection.
            row = pl.multiple_of(t * Bp, Bp)
            g0 = (gih0_ref[pl.ds(row, Bp), :]
                  + jnp.dot(h1, whh0, preferred_element_type=jnp.float32))
            h1, c1 = activate(g0, c1)
            # Layer 1.
            g1 = jnp.dot(h1, wih1, preferred_element_type=jnp.float32) + g1_rec
            h2, c2 = activate(g1, c2)
            return h1, c1, h2, c2

        z = jnp.zeros((Bp, H), jnp.float32)
        _, _, h2_last, _ = jax.lax.fori_loop(0, T, step, (z, z, z, z), unroll=True)

        # Final Linear on the last timestep's layer-1 hidden state.
        out_ref[...] = (jnp.dot(h2_last, wfc_ref[...],
                                preferred_element_type=jnp.float32)
                        + bfc_ref[...]).astype(out_ref.dtype)

    return kernel


@functools.partial(jax.jit, static_argnames=("hidden_size", "output_size"))
def lstm_model_forward(x, params, *, hidden_size, output_size):
    """x: (B, T, D) batch_first, like the PyTorch module.  Returns (B, output_size)."""
    B, T, D = x.shape
    H = hidden_size
    O = output_size
    Bp = max(8, _round_up(B, 8))   # pad batch to a full sublane multiple

    # Single fused XLA relayout: time-major, batch-padded 2-D slab so the kernel's
    # hoisted layer-0 matmul and per-step gate reads are plain aligned slices
    # (row t*Bp + b == x[b, t]; padded rows are zero and carried along harmlessly).
    x_tm = jnp.transpose(x, (1, 0, 2))                       # (T, B, D)
    if Bp != B:
        x_tm = jnp.pad(x_tm, ((0, 0), (0, Bp - B), (0, 0)))  # (T, Bp, D)
    x_tm = x_tm.reshape(T * Bp, D)

    kernel = _make_kernel(Bp, T, H)

    # No grid: the full x slab + all weights easily fit in VMEM at these shapes
    # (and still well under the scoped VMEM limit at the module's default
    # D=1280, H=256), so everything is loaded once and the whole forward runs in
    # a single kernel invocation.
    out = pl.pallas_call(
        kernel,
        out_shape=jax.ShapeDtypeStruct((Bp, O), x.dtype),
        scratch_shapes=[pltpu.VMEM((T * Bp, 4 * H), jnp.float32)],
    )(x_tm,
      params["wih0_t"], params["whh0_t"], params["b0"],
      params["wih1_t"], params["whh1_t"], params["b1"],
      params["wfc_t"], params["bfc"])
    return out[:B]


def init_params(key, input_size, hidden_size, output_size):
    """Deterministic uniform(-1/sqrt(H), 1/sqrt(H)) init (PyTorch-style ranges)."""
    H = hidden_size
    k = 1.0 / jnp.sqrt(jnp.float32(H))
    keys = jax.random.split(key, 11)
    u = lambda kk, shape: jax.random.uniform(kk, shape, jnp.float32, -k, k)
    # PyTorch stores weight_ih as (4H, in); we store the transpose for x @ W.
    wih0 = u(keys[0], (4 * H, input_size))
    whh0 = u(keys[1], (4 * H, H))
    b_ih0 = u(keys[2], (4 * H,))
    b_hh0 = u(keys[3], (4 * H,))
    wih1 = u(keys[4], (4 * H, H))
    whh1 = u(keys[5], (4 * H, H))
    b_ih1 = u(keys[6], (4 * H,))
    b_hh1 = u(keys[7], (4 * H,))
    wfc = u(keys[8], (output_size, H))
    bfc = u(keys[9], (output_size,))
    return {
        "wih0_t": wih0.T, "whh0_t": whh0.T, "b0": (b_ih0 + b_hh0)[None, :],
        "wih1_t": wih1.T, "whh1_t": whh1.T, "b1": (b_ih1 + b_hh1)[None, :],
        "wfc_t": wfc.T, "bfc": bfc[None, :],
    }


def reference_forward(x, params, hidden_size, output_size):
    """Pure-JAX reference (lax.scan) of the same LSTM -> fc, for verification."""
    B, T, D = x.shape
    H = hidden_size

    def cell(x_in, h, c, wih_t, whh_t, b):
        g = x_in @ wih_t + h @ whh_t + b
        i = jax.nn.sigmoid(g[:, 0 * H:1 * H])
        f = jax.nn.sigmoid(g[:, 1 * H:2 * H])
        gg = jnp.tanh(g[:, 2 * H:3 * H])
        o = jax.nn.sigmoid(g[:, 3 * H:4 * H])
        c_new = f * c + i * gg
        h_new = o * jnp.tanh(c_new)
        return h_new, c_new

    def step(carry, x_t):
        h1, c1, h2, c2 = carry
        h1, c1 = cell(x_t, h1, c1, params["wih0_t"], params["whh0_t"], params["b0"])
        h2, c2 = cell(h1, h2, c2, params["wih1_t"], params["whh1_t"], params["b1"])
        return (h1, c1, h2, c2), h2

    z = jnp.zeros((B, H), jnp.float32)
    (_, _, h2_last, _), _ = jax.lax.scan(step, (z, z, z, z),
                                         jnp.transpose(x, (1, 0, 2)))
    return h2_last @ params["wfc_t"] + params["bfc"]


if __name__ == "__main__":
    # Small shapes consistent with the module's forward: x is (batch, seq, input_size).
    B, T, D, H, O = 2, 8, 128, 32, 1

    key = jax.random.PRNGKey(0)
    kx, kp = jax.random.split(key)
    x = jax.random.normal(kx, (B, T, D), dtype=jnp.float32)
    params = init_params(kp, D, H, O)

    out = lstm_model_forward(x, params, hidden_size=H, output_size=O)
    out = jax.block_until_ready(out)

    ref = reference_forward(x, params, H, O)
    assert out.shape == (B, O)
    assert jnp.allclose(out, ref, atol=1e-4, rtol=1e-4), (out, ref)

    print("KERNEL_OK")
</pallas_src>

<mosaic_0001>
module attributes {stable_mosaic.version = 11 : i64} {
  func.func @kernel(%arg0: memref<64x128xf32, #tpu.memory_space<vmem>>, %arg1: memref<128x128xf32, #tpu.memory_space<vmem>>, %arg2: memref<32x128xf32, #tpu.memory_space<vmem>>, %arg3: memref<1x128xf32, #tpu.memory_space<vmem>>, %arg4: memref<32x128xf32, #tpu.memory_space<vmem>>, %arg5: memref<32x128xf32, #tpu.memory_space<vmem>>, %arg6: memref<1x128xf32, #tpu.memory_space<vmem>>, %arg7: memref<32x1xf32, #tpu.memory_space<vmem>>, %arg8: memref<1x1xf32, #tpu.memory_space<vmem>>, %arg9: memref<8x1xf32, #tpu.memory_space<vmem>>, %arg10: memref<64x128xf32, #tpu.memory_space<vmem>>) attributes {dimension_semantics = [], scalar_prefetch = 0 : i64, scratch_operands = 1 : i64, tpu.core_type = #tpu.core_type<tc>} {
    %c0 = arith.constant 0 : index
    %c0_0 = arith.constant 0 : index
    %0 = vector.load %arg0[%c0, %c0_0] : memref<64x128xf32, #tpu.memory_space<vmem>>, vector<64x128xf32>
    %c0_1 = arith.constant 0 : index
    %c0_2 = arith.constant 0 : index
    %1 = vector.load %arg1[%c0_1, %c0_2] : memref<128x128xf32, #tpu.memory_space<vmem>>, vector<128x128xf32>
    %cst = arith.constant dense<0.000000e+00> : vector<64x128xf32>
    %2 = tpu.matmul %0, %1, %cst {dimension_numbers = #tpu.dot_dimension_numbers<[1], [0], [0], [1], [0, 0, 1, 1], [], []>} : vector<64x128xf32>, vector<128x128xf32>, vector<64x128xf32> -> vector<64x128xf32>
    %c0_3 = arith.constant 0 : index
    %c0_4 = arith.constant 0 : index
    %3 = vector.load %arg3[%c0_3, %c0_4] : memref<1x128xf32, #tpu.memory_space<vmem>>, vector<1x128xf32>
    %4 = vector.broadcast %3 : vector<1x128xf32> to vector<64x128xf32>
    %5 = arith.addf %2, %4 : vector<64x128xf32>
    %c0_5 = arith.constant 0 : index
    %c0_6 = arith.constant 0 : index
    %6 = vector.load %arg10[%c0_5, %c0_6] : memref<64x128xf32, #tpu.memory_space<vmem>>, vector<64x128xf32>
    tpu.vector_store %arg10[%c0_5, %c0_6], %5 {strides = array<i32>} : memref<64x128xf32, #tpu.memory_space<vmem>>, vector<64x128xf32>,
    %c0_7 = arith.constant 0 : index
    %c0_8 = arith.constant 0 : index
    %7 = vector.load %arg2[%c0_7, %c0_8] : memref<32x128xf32, #tpu.memory_space<vmem>>, vector<32x128xf32>
    %c0_9 = arith.constant 0 : index
    %c0_10 = arith.constant 0 : index
    %8 = vector.load %arg4[%c0_9, %c0_10] : memref<32x128xf32, #tpu.memory_space<vmem>>, vector<32x128xf32>
    %c0_11 = arith.constant 0 : index
    %c0_12 = arith.constant 0 : index
    %9 = vector.load %arg5[%c0_11, %c0_12] : memref<32x128xf32, #tpu.memory_space<vmem>>, vector<32x128xf32>
    %c0_13 = arith.constant 0 : index
    %c0_14 = arith.constant 0 : index
    %10 = vector.load %arg6[%c0_13, %c0_14] : memref<1x128xf32, #tpu.memory_space<vmem>>, vector<1x128xf32>
    %cst_15 = arith.constant 0.000000e+00 : f32
    %11 = vector.broadcast %cst_15 : f32 to vector<8x32xf32>
    %c0_i32 = arith.constant 0 : i32
    %cst_16 = arith.constant dense<0.000000e+00> : vector<8x128xf32>
    %12 = tpu.matmul %11, %9, %cst_16 {dimension_numbers = #tpu.dot_dimension_numbers<[1], [0], [0], [1], [0, 0, 1, 1], [], []>} : vector<8x32xf32>, vector<32x128xf32>, vector<8x128xf32> -> vector<8x128xf32>
    %13 = vector.broadcast %10 : vector<1x128xf32> to vector<8x128xf32>
    %14 = arith.addf %12, %13 : vector<8x128xf32>
    %c8_i32 = arith.constant 8 : i32
    %15 = arith.muli %c0_i32, %c8_i32 : i32
    %16 = tpu.assume_multiple %15, 8 : i32
    %17 = arith.index_cast %16 : i32 to index
    %c0_17 = arith.constant 0 : index
    %18 = vector.load %arg10[%17, %c0_17] : memref<64x128xf32, #tpu.memory_space<vmem>>, vector<8x128xf32>
    %cst_18 = arith.constant dense<0.000000e+00> : vector<8x128xf32>
    %19 = tpu.matmul %11, %7, %cst_18 {dimension_numbers = #tpu.dot_dimension_numbers<[1], [0], [0], [1], [0, 0, 1, 1], [], []>} : vector<8x32xf32>, vector<32x128xf32>, vector<8x128xf32> -> vector<8x128xf32>
    %20 = arith.addf %18, %19 : vector<8x128xf32>
    %21 = vector.extract_strided_slice %20 {offsets = [0, 0], sizes = [8, 32], strides = [1, 1]} : vector<8x128xf32> to vector<8x32xf32>
    %22 = arith.negf %21 : vector<8x32xf32>
    %23 = math.exp %22 : vector<8x32xf32>
    %cst_19 = arith.constant 1.000000e+00 : f32
    %24 = vector.broadcast %cst_19 : f32 to vector<8x32xf32>
    %25 = arith.addf %24, %23 : vector<8x32xf32>
    %26 = arith.divf %24, %25 : vector<8x32xf32>
    %27 = vector.extract_strided_slice %20 {offsets = [0, 32], sizes = [8, 32], strides = [1, 1]} : vector<8x128xf32> to vector<8x32xf32>
    %28 = arith.negf %27 : vector<8x32xf32>
    %29 = math.exp %28 : vector<8x32xf32>
    %cst_20 = arith.constant 1.000000e+00 : f32
    %30 = vector.broadcast %cst_20 : f32 to vector<8x32xf32>
    %31 = arith.addf %30, %29 : vector<8x32xf32>
    %32 = arith.divf %30, %31 : vector<8x32xf32>
    %33 = vector.extract_strided_slice %20 {offsets = [0, 64], sizes = [8, 32], strides = [1, 1]} : vector<8x128xf32> to vector<8x32xf32>
    %34 = math.tanh %33 : vector<8x32xf32>
    %35 = vector.extract_strided_slice %20 {offsets = [0, 96], sizes = [8, 32], strides = [1, 1]} : vector<8x128xf32> to vector<8x32xf32>
    %36 = arith.negf %35 : vector<8x32xf32>
    %37 = math.exp %36 : vector<8x32xf32>
    %cst_21 = arith.constant 1.000000e+00 : f32
    %38 = vector.broadcast %cst_21 : f32 to vector<8x32xf32>
    %39 = arith.addf %38, %37 : vector<8x32xf32>
    %40 = arith.divf %38, %39 : vector<8x32xf32>
    %41 = arith.mulf %32, %11 : vector<8x32xf32>
    %42 = arith.mulf %26, %34 : vector<8x32xf32>
    %43 = arith.addf %41, %42 : vector<8x32xf32>
    %44 = math.tanh %43 : vector<8x32xf32>
    %45 = arith.mulf %40, %44 : vector<8x32xf32>
    %cst_22 = arith.constant dense<0.000000e+00> : vector<8x128xf32>
    %46 = tpu.matmul %45, %8, %cst_22 {dimension_numbers = #tpu.dot_dimension_numbers<[1], [0], [0], [1], [0, 0, 1, 1], [], []>} : vector<8x32xf32>, vector<32x128xf32>, vector<8x128xf32> -> vector<8x128xf32>
    %47 = arith.addf %46, %14 : vector<8x128xf32>
    %48 = vector.extract_strided_slice %47 {offsets = [0, 0], sizes = [8, 32], strides = [1, 1]} : vector<8x128xf32> to vector<8x32xf32>
    %49 = arith.negf %48 : vector<8x32xf32>
    %50 = math.exp %49 : vector<8x32xf32>
    %cst_23 = arith.constant 1.000000e+00 : f32
    %51 = vector.broadcast %cst_23 : f32 to vector<8x32xf32>
    %52 = arith.addf %51, %50 : vector<8x32xf32>
    %53 = arith.divf %51, %52 : vector<8x32xf32>
    %54 = vector.extract_strided_slice %47 {offsets = [0, 32], sizes = [8, 32], strides = [1, 1]} : vector<8x128xf32> to vector<8x32xf32>
    %55 = arith.negf %54 : vector<8x32xf32>
    %56 = math.exp %55 : vector<8x32xf32>
    %cst_24 = arith.constant 1.000000e+00 : f32
    %57 = vector.broadcast %cst_24 : f32 to vector<8x32xf32>
    %58 = arith.addf %57, %56 : vector<8x32xf32>
    %59 = arith.divf %57, %58 : vector<8x32xf32>
    %60 = vector.extract_strided_slice %47 {offsets = [0, 64], sizes = [8, 32], strides = [1, 1]} : vector<8x128xf32> to vector<8x32xf32>
    %61 = math.tanh %60 : vector<8x32xf32>
    %62 = vector.extract_strided_slice %47 {offsets = [0, 96], sizes = [8, 32], strides = [1, 1]} : vector<8x128xf32> to vector<8x32xf32>
    %63 = arith.negf %62 : vector<8x32xf32>
    %64 = math.exp %63 : vector<8x32xf32>
    %cst_25 = arith.constant 1.000000e+00 : f32
    %65 = vector.broadcast %cst_25 : f32 to vector<8x32xf32>
    %66 = arith.addf %65, %64 : vector<8x32xf32>
    %67 = arith.divf %65, %66 : vector<8x32xf32>
    %68 = arith.mulf %59, %11 : vector<8x32xf32>
    %69 = arith.mulf %53, %61 : vector<8x32xf32>
    %70 = arith.addf %68, %69 : vector<8x32xf32>
    %71 = math.tanh %70 : vector<8x32xf32>
    %72 = arith.mulf %67, %71 : vector<8x32xf32>
    %c1_i32 = arith.constant 1 : i32
    %cst_26 = arith.constant dense<0.000000e+00> : vector<8x128xf32>
    %73 = tpu.matmul %72, %9, %cst_26 {dimension_numbers = #tpu.dot_dimension_numbers<[1], [0], [0], [1], [0, 0, 1, 1], [], []>} : vector<8x32xf32>, vector<32x128xf32>, vector<8x128xf32> -> vector<8x128xf32>
    %74 = vector.broadcast %10 : vector<1x128xf32> to vector<8x128xf32>
    %75 = arith.addf %73, %74 : vector<8x128xf32>
    %c8_i32_27 = arith.constant 8 : i32
    %76 = arith.muli %c1_i32, %c8_i32_27 : i32
    %77 = tpu.assume_multiple %76, 8 : i32
    %78 = arith.index_cast %77 : i32 to index
    %c0_28 = arith.constant 0 : index
    %79 = vector.load %arg10[%78, %c0_28] : memref<64x128xf32, #tpu.memory_space<vmem>>, vector<8x128xf32>
    %cst_29 = arith.constant dense<0.000000e+00> : vector<8x128xf32>
    %80 = tpu.matmul %45, %7, %cst_29 {dimension_numbers = #tpu.dot_dimension_numbers<[1], [0], [0], [1], [0, 0, 1, 1], [], []>} : vector<8x32xf32>, vector<32x128xf32>, vector<8x128xf32> -> vector<8x128xf32>
    %81 = arith.addf %79, %80 : vector<8x128xf32>
    %82 = vector.extract_strided_slice %81 {offsets = [0, 0], sizes = [8, 32], strides = [1, 1]} : vector<8x128xf32> to vector<8x32xf32>
    %83 = arith.negf %82 : vector<8x32xf32>
    %84 = math.exp %83 : vector<8x32xf32>
    %cst_30 = arith.constant 1.000000e+00 : f32
    %85 = vector.broadcast %cst_30 : f32 to vector<8x32xf32>
    %86 = arith.addf %85, %84 : vector<8x32xf32>
    %87 = arith.divf %85, %86 : vector<8x32xf32>
    %88 = vector.extract_strided_slice %81 {offsets = [0, 32], sizes = [8, 32], strides = [1, 1]} : vector<8x128xf32> to vector<8x32xf32>
    %89 = arith.negf %88 : vector<8x32xf32>
    %90 = math.exp %89 : vector<8x32xf32>
    %cst_31 = arith.constant 1.000000e+00 : f32
    %91 = vector.broadcast %cst_31 : f32 to vector<8x32xf32>
    %92 = arith.addf %91, %90 : vector<8x32xf32>
    %93 = arith.divf %91, %92 : vector<8x32xf32>
    %94 = vector.extract_strided_slice %81 {offsets = [0, 64], sizes = [8, 32], strides = [1, 1]} : vector<8x128xf32> to vector<8x32xf32>
    %95 = math.tanh %94 : vector<8x32xf32>
    %96 = vector.extract_strided_slice %81 {offsets = [0, 96], sizes = [8, 32], strides = [1, 1]} : vector<8x128xf32> to vector<8x32xf32>
    %97 = arith.negf %96 : vector<8x32xf32>
    %98 = math.exp %97 : vector<8x32xf32>
    %cst_32 = arith.constant 1.000000e+00 : f32
    %99 = vector.broadcast %cst_32 : f32 to vector<8x32xf32>
    %100 = arith.addf %99, %98 : vector<8x32xf32>
    %101 = arith.divf %99, %100 : vector<8x32xf32>
    %102 = arith.mulf %93, %43 : vector<8x32xf32>
    %103 = arith.mulf %87, %95 : vector<8x32xf32>
    %104 = arith.addf %102, %103 : vector<8x32xf32>
    %105 = math.tanh %104 : vector<8x32xf32>
    %106 = arith.mulf %101, %105 : vector<8x32xf32>
    %cst_33 = arith.constant dense<0.000000e+00> : vector<8x128xf32>
    %107 = tpu.matmul %106, %8, %cst_33 {dimension_numbers = #tpu.dot_dimension_numbers<[1], [0], [0], [1], [0, 0, 1, 1], [], []>} : vector<8x32xf32>, vector<32x128xf32>, vector<8x128xf32> -> vector<8x128xf32>
    %108 = arith.addf %107, %75 : vector<8x128xf32>
    %109 = vector.extract_strided_slice %108 {offsets = [0, 0], sizes = [8, 32], strides = [1, 1]} : vector<8x128xf32> to vector<8x32xf32>
    %110 = arith.negf %109 : vector<8x32xf32>
    %111 = math.exp %110 : vector<8x32xf32>
    %cst_34 = arith.constant 1.000000e+00 : f32
    %112 = vector.broadcast %cst_34 : f32 to vector<8x32xf32>
    %113 = arith.addf %112, %111 : vector<8x32xf32>
    %114 = arith.divf %112, %113 : vector<8x32xf32>
    %115 = vector.extract_strided_slice %108 {offsets = [0, 32], sizes = [8, 32], strides = [1, 1]} : vector<8x128xf32> to vector<8x32xf32>
    %116 = arith.negf %115 : vector<8x32xf32>
    %117 = math.exp %116 : vector<8x32xf32>
    %cst_35 = arith.constant 1.000000e+00 : f32
    %118 = vector.broadcast %cst_35 : f32 to vector<8x32xf32>
    %119 = arith.addf %118, %117 : vector<8x32xf32>
    %120 = arith.divf %118, %119 : vector<8x32xf32>
    %121 = vector.extract_strided_slice %108 {offsets = [0, 64], sizes = [8, 32], strides = [1, 1]} : vector<8x128xf32> to vector<8x32xf32>
    %122 = math.tanh %121 : vector<8x32xf32>
    %123 = vector.extract_strided_slice %108 {offsets = [0, 96], sizes = [8, 32], strides = [1, 1]} : vector<8x128xf32> to vector<8x32xf32>
    %124 = arith.negf %123 : vector<8x32xf32>
    %125 = math.exp %124 : vector<8x32xf32>
    %cst_36 = arith.constant 1.000000e+00 : f32
    %126 = vector.broadcast %cst_36 : f32 to vector<8x32xf32>
    %127 = arith.addf %126, %125 : vector<8x32xf32>
    %128 = arith.divf %126, %127 : vector<8x32xf32>
    %129 = arith.mulf %120, %70 : vector<8x32xf32>
    %130 = arith.mulf %114, %122 : vector<8x32xf32>
    %131 = arith.addf %129, %130 : vector<8x32xf32>
    %132 = math.tanh %131 : vector<8x32xf32>
    %133 = arith.mulf %128, %132 : vector<8x32xf32>
    %c2_i32 = arith.constant 2 : i32
    %cst_37 = arith.constant dense<0.000000e+00> : vector<8x128xf32>
    %134 = tpu.matmul %133, %9, %cst_37 {dimension_numbers = #tpu.dot_dimension_numbers<[1], [0], [0], [1], [0, 0, 1, 1], [], []>} : vector<8x32xf32>, vector<32x128xf32>, vector<8x128xf32> -> vector<8x128xf32>
    %135 = vector.broadcast %10 : vector<1x128xf32> to vector<8x128xf32>
    %136 = arith.addf %134, %135 : vector<8x128xf32>
    %c8_i32_38 = arith.constant 8 : i32
    %137 = arith.muli %c2_i32, %c8_i32_38 : i32
    %138 = tpu.assume_multiple %137, 8 : i32
    %139 = arith.index_cast %138 : i32 to index
    %c0_39 = arith.constant 0 : index
    %140 = vector.load %arg10[%139, %c0_39] : memref<64x128xf32, #tpu.memory_space<vmem>>, vector<8x128xf32>
    %cst_40 = arith.constant dense<0.000000e+00> : vector<8x128xf32>
    %141 = tpu.matmul %106, %7, %cst_40 {dimension_numbers = #tpu.dot_dimension_numbers<[1], [0], [0], [1], [0, 0, 1, 1], [], []>} : vector<8x32xf32>, vector<32x128xf32>, vector<8x128xf32> -> vector<8x128xf32>
    %142 = arith.addf %140, %141 : vector<8x128xf32>
    %143 = vector.extract_strided_slice %142 {offsets = [0, 0], sizes = [8, 32], strides = [1, 1]} : vector<8x128xf32> to vector<8x32xf32>
    %144 = arith.negf %143 : vector<8x32xf32>
    %145 = math.exp %144 : vector<8x32xf32>
    %cst_41 = arith.constant 1.000000e+00 : f32
    %146 = vector.broadcast %cst_41 : f32 to vector<8x32xf32>
    %147 = arith.addf %146, %145 : vector<8x32xf32>
    %148 = arith.divf %146, %147 : vector<8x32xf32>
    %149 = vector.extract_strided_slice %142 {offsets = [0, 32], sizes = [8, 32], strides = [1, 1]} : vector<8x128xf32> to vector<8x32xf32>
    %150 = arith.negf %149 : vector<8x32xf32>
    %151 = math.exp %150 : vector<8x32xf32>
    %cst_42 = arith.constant 1.000000e+00 : f32
    %152 = vector.broadcast %cst_42 : f32 to vector<8x32xf32>
    %153 = arith.addf %152, %151 : vector<8x32xf32>
    %154 = arith.divf %152, %153 : vector<8x32xf32>
    %155 = vector.extract_strided_slice %142 {offsets = [0, 64], sizes = [8, 32], strides = [1, 1]} : vector<8x128xf32> to vector<8x32xf32>
    %156 = math.tanh %155 : vector<8x32xf32>
    %157 = vector.extract_strided_slice %142 {offsets = [0, 96], sizes = [8, 32], strides = [1, 1]} : vector<8x128xf32> to vector<8x32xf32>
    %158 = arith.negf %157 : vector<8x32xf32>
    %159 = math.exp %158 : vector<8x32xf32>
    %cst_43 = arith.constant 1.000000e+00 : f32
    %160 = vector.broadcast %cst_43 : f32 to vector<8x32xf32>
    %161 = arith.addf %160, %159 : vector<8x32xf32>
    %162 = arith.divf %160, %161 : vector<8x32xf32>
    %163 = arith.mulf %154, %104 : vector<8x32xf32>
    %164 = arith.mulf %148, %156 : vector<8x32xf32>
    %165 = arith.addf %163, %164 : vector<8x32xf32>
    %166 = math.tanh %165 : vector<8x32xf32>
    %167 = arith.mulf %162, %166 : vector<8x32xf32>
    %cst_44 = arith.constant dense<0.000000e+00> : vector<8x128xf32>
    %168 = tpu.matmul %167, %8, %cst_44 {dimension_numbers = #tpu.dot_dimension_numbers<[1], [0], [0], [1], [0, 0, 1, 1], [], []>} : vector<8x32xf32>, vector<32x128xf32>, vector<8x128xf32> -> vector<8x128xf32>
    %169 = arith.addf %168, %136 : vector<8x128xf32>
    %170 = vector.extract_strided_slice %169 {offsets = [0, 0], sizes = [8, 32], strides = [1, 1]} : vector<8x128xf32> to vector<8x32xf32>
    %171 = arith.negf %170 : vector<8x32xf32>
    %172 = math.exp %171 : vector<8x32xf32>
    %cst_45 = arith.constant 1.000000e+00 : f32
    %173 = vector.broadcast %cst_45 : f32 to vector<8x32xf32>
    %174 = arith.addf %173, %172 : vector<8x32xf32>
    %175 = arith.divf %173, %174 : vector<8x32xf32>
    %176 = vector.extract_strided_slice %169 {offsets = [0, 32], sizes = [8, 32], strides = [1, 1]} : vector<8x128xf32> to vector<8x32xf32>
    %177 = arith.negf %176 : vector<8x32xf32>
    %178 = math.exp %177 : vector<8x32xf32>
    %cst_46 = arith.constant 1.000000e+00 : f32
    %179 = vector.broadcast %cst_46 : f32 to vector<8x32xf32>
    %180 = arith.addf %179, %178 : vector<8x32xf32>
    %181 = arith.divf %179, %180 : vector<8x32xf32>
    %182 = vector.extract_strided_slice %169 {offsets = [0, 64], sizes = [8, 32], strides = [1, 1]} : vector<8x128xf32> to vector<8x32xf32>
    %183 = math.tanh %182 : vector<8x32xf32>
    %184 = vector.extract_strided_slice %169 {offsets = [0, 96], sizes = [8, 32], strides = [1, 1]} : vector<8x128xf32> to vector<8x32xf32>
    %185 = arith.negf %184 : vector<8x32xf32>
    %186 = math.exp %185 : vector<8x32xf32>
    %cst_47 = arith.constant 1.000000e+00 : f32
    %187 = vector.broadcast %cst_47 : f32 to vector<8x32xf32>
    %188 = arith.addf %187, %186 : vector<8x32xf32>
    %189 = arith.divf %187, %188 : vector<8x32xf32>
    %190 = arith.mulf %181, %131 : vector<8x32xf32>
    %191 = arith.mulf %175, %183 : vector<8x32xf32>
    %192 = arith.addf %190, %191 : vector<8x32xf32>
    %193 = math.tanh %192 : vector<8x32xf32>
    %194 = arith.mulf %189, %193 : vector<8x32xf32>
    %c3_i32 = arith.constant 3 : i32
    %cst_48 = arith.constant dense<0.000000e+00> : vector<8x128xf32>
    %195 = tpu.matmul %194, %9, %cst_48 {dimension_numbers = #tpu.dot_dimension_numbers<[1], [0], [0], [1], [0, 0, 1, 1], [], []>} : vector<8x32xf32>, vector<32x128xf32>, vector<8x128xf32> -> vector<8x128xf32>
    %196 = vector.broadcast %10 : vector<1x128xf32> to vector<8x128xf32>
    %197 = arith.addf %195, %196 : vector<8x128xf32>
    %c8_i32_49 = arith.constant 8 : i32
    %198 = arith.muli %c3_i32, %c8_i32_49 : i32
    %199 = tpu.assume_multiple %198, 8 : i32
    %200 = arith.index_cast %199 : i32 to index
    %c0_50 = arith.constant 0 : index
    %201 = vector.load %arg10[%200, %c0_50] : memref<64x128xf32, #tpu.memory_space<vmem>>, vector<8x128xf32>
    %cst_51 = arith.constant dense<0.000000e+00> : vector<8x128xf32>
    %202 = tpu.matmul %167, %7, %cst_51 {dimension_numbers = #tpu.dot_dimension_numbers<[1], [0], [0], [1], [0, 0, 1, 1], [], []>} : vector<8x32xf32>, vector<32x128xf32>, vector<8x128xf32> -> vector<8x128xf32>
    %203 = arith.addf %201, %202 : vector<8x128xf32>
    %204 = vector.extract_strided_slice %203 {offsets = [0, 0], sizes = [8, 32], strides = [1, 1]} : vector<8x128xf32> to vector<8x32xf32>
    %205 = arith.negf %204 : vector<8x32xf32>
    %206 = math.exp %205 : vector<8x32xf32>
    %cst_52 = arith.constant 1.000000e+00 : f32
    %207 = vector.broadcast %cst_52 : f32 to vector<8x32xf32>
    %208 = arith.addf %207, %206 : vector<8x32xf32>
    %209 = arith.divf %207, %208 : vector<8x32xf32>
    %210 = vector.extract_strided_slice %203 {offsets = [0, 32], sizes = [8, 32], strides = [1, 1]} : vector<8x128xf32> to vector<8x32xf32>
    %211 = arith.negf %210 : vector<8x32xf32>
    %212 = math.exp %211 : vector<8x32xf32>
    %cst_53 = arith.constant 1.000000e+00 : f32
    %213 = vector.broadcast %cst_53 : f32 to vector<8x32xf32>
    %214 = arith.addf %213, %212 : vector<8x32xf32>
    %215 = arith.divf %213, %214 : vector<8x32xf32>
    %216 = vector.extract_strided_slice %203 {offsets = [0, 64], sizes = [8, 32], strides = [1, 1]} : vector<8x128xf32> to vector<8x32xf32>
    %217 = math.tanh %216 : vector<8x32xf32>
    %218 = vector.extract_strided_slice %203 {offsets = [0, 96], sizes = [8, 32], strides = [1, 1]} : vector<8x128xf32> to vector<8x32xf32>
    %219 = arith.negf %218 : vector<8x32xf32>
    %220 = math.exp %219 : vector<8x32xf32>
    %cst_54 = arith.constant 1.000000e+00 : f32
    %221 = vector.broadcast %cst_54 : f32 to vector<8x32xf32>
    %222 = arith.addf %221, %220 : vector<8x32xf32>
    %223 = arith.divf %221, %222 : vector<8x32xf32>
    %224 = arith.mulf %215, %165 : vector<8x32xf32>
    %225 = arith.mulf %209, %217 : vector<8x32xf32>
    %226 = arith.addf %224, %225 : vector<8x32xf32>
    %227 = math.tanh %226 : vector<8x32xf32>
    %228 = arith.mulf %223, %227 : vector<8x32xf32>
    %cst_55 = arith.constant dense<0.000000e+00> : vector<8x128xf32>
    %229 = tpu.matmul %228, %8, %cst_55 {dimension_numbers = #tpu.dot_dimension_numbers<[1], [0], [0], [1], [0, 0, 1, 1], [], []>} : vector<8x32xf32>, vector<32x128xf32>, vector<8x128xf32> -> vector<8x128xf32>
    %230 = arith.addf %229, %197 : vector<8x128xf32>
    %231 = vector.extract_strided_slice %230 {offsets = [0, 0], sizes = [8, 32], strides = [1, 1]} : vector<8x128xf32> to vector<8x32xf32>
    %232 = arith.negf %231 : vector<8x32xf32>
    %233 = math.exp %232 : vector<8x32xf32>
    %cst_56 = arith.constant 1.000000e+00 : f32
    %234 = vector.broadcast %cst_56 : f32 to vector<8x32xf32>
    %235 = arith.addf %234, %233 : vector<8x32xf32>
    %236 = arith.divf %234, %235 : vector<8x32xf32>
    %237 = vector.extract_strided_slice %230 {offsets = [0, 32], sizes = [8, 32], strides = [1, 1]} : vector<8x128xf32> to vector<8x32xf32>
    %238 = arith.negf %237 : vector<8x32xf32>
    %239 = math.exp %238 : vector<8x32xf32>
    %cst_57 = arith.constant 1.000000e+00 : f32
    %240 = vector.broadcast %cst_57 : f32 to vector<8x32xf32>
    %241 = arith.addf %240, %239 : vector<8x32xf32>
    %242 = arith.divf %240, %241 : vector<8x32xf32>
    %243 = vector.extract_strided_slice %230 {offsets = [0, 64], sizes = [8, 32], strides = [1, 1]} : vector<8x128xf32> to vector<8x32xf32>
    %244 = math.tanh %243 : vector<8x32xf32>
    %245 = vector.extract_strided_slice %230 {offsets = [0, 96], sizes = [8, 32], strides = [1, 1]} : vector<8x128xf32> to vector<8x32xf32>
    %246 = arith.negf %245 : vector<8x32xf32>
    %247 = math.exp %246 : vector<8x32xf32>
    %cst_58 = arith.constant 1.000000e+00 : f32
    %248 = vector.broadcast %cst_58 : f32 to vector<8x32xf32>
    %249 = arith.addf %248, %247 : vector<8x32xf32>
    %250 = arith.divf %248, %249 : vector<8x32xf32>
    %251 = arith.mulf %242, %192 : vector<8x32xf32>
    %252 = arith.mulf %236, %244 : vector<8x32xf32>
    %253 = arith.addf %251, %252 : vector<8x32xf32>
    %254 = math.tanh %253 : vector<8x32xf32>
    %255 = arith.mulf %250, %254 : vector<8x32xf32>
    %c4_i32 = arith.constant 4 : i32
    %cst_59 = arith.constant dense<0.000000e+00> : vector<8x128xf32>
    %256 = tpu.matmul %255, %9, %cst_59 {dimension_numbers = #tpu.dot_dimension_numbers<[1], [0], [0], [1], [0, 0, 1, 1], [], []>} : vector<8x32xf32>, vector<32x128xf32>, vector<8x128xf32> -> vector<8x128xf32>
    %257 = vector.broadcast %10 : vector<1x128xf32> to vector<8x128xf32>
    %258 = arith.addf %256, %257 : vector<8x128xf32>
    %c8_i32_60 = arith.constant 8 : i32
    %259 = arith.muli %c4_i32, %c8_i32_60 : i32
    %260 = tpu.assume_multiple %259, 8 : i32
    %261 = arith.index_cast %260 : i32 to index
    %c0_61 = arith.constant 0 : index
    %262 = vector.load %arg10[%261, %c0_61] : memref<64x128xf32, #tpu.memory_space<vmem>>, vector<8x128xf32>
    %cst_62 = arith.constant dense<0.000000e+00> : vector<8x128xf32>
    %263 = tpu.matmul %228, %7, %cst_62 {dimension_numbers = #tpu.dot_dimension_numbers<[1], [0], [0], [1], [0, 0, 1, 1], [], []>} : vector<8x32xf32>, vector<32x128xf32>, vector<8x128xf32> -> vector<8x128xf32>
    %264 = arith.addf %262, %263 : vector<8x128xf32>
    %265 = vector.extract_strided_slice %264 {offsets = [0, 0], sizes = [8, 32], strides = [1, 1]} : vector<8x128xf32> to vector<8x32xf32>
    %266 = arith.negf %265 : vector<8x32xf32>
    %267 = math.exp %266 : vector<8x32xf32>
    %cst_63 = arith.constant 1.000000e+00 : f32
    %268 = vector.broadcast %cst_63 : f32 to vector<8x32xf32>
    %269 = arith.addf %268, %267 : vector<8x32xf32>
    %270 = arith.divf %268, %269 : vector<8x32xf32>
    %271 = vector.extract_strided_slice %264 {offsets = [0, 32], sizes = [8, 32], strides = [1, 1]} : vector<8x128xf32> to vector<8x32xf32>
    %272 = arith.negf %271 : vector<8x32xf32>
    %273 = math.exp %272 : vector<8x32xf32>
    %cst_64 = arith.constant 1.000000e+00 : f32
    %274 = vector.broadcast %cst_64 : f32 to vector<8x32xf32>
    %275 = arith.addf %274, %273 : vector<8x32xf32>
    %276 = arith.divf %274, %275 : vector<8x32xf32>
    %277 = vector.extract_strided_slice %264 {offsets = [0, 64], sizes = [8, 32], strides = [1, 1]} : vector<8x128xf32> to vector<8x32xf32>
    %278 = math.tanh %277 : vector<8x32xf32>
    %279 = vector.extract_strided_slice %264 {offsets = [0, 96], sizes = [8, 32], strides = [1, 1]} : vector<8x128xf32> to vector<8x32xf32>
    %280 = arith.negf %279 : vector<8x32xf32>
    %281 = math.exp %280 : vector<8x32xf32>
    %cst_65 = arith.constant 1.000000e+00 : f32
    %282 = vector.broadcast %cst_65 : f32 to vector<8x32xf32>
    %283 = arith.addf %282, %281 : vector<8x32xf32>
    %284 = arith.divf %282, %283 : vector<8x32xf32>
    %285 = arith.mulf %276, %226 : vector<8x32xf32>
    %286 = arith.mulf %270, %278 : vector<8x32xf32>
    %287 = arith.addf %285, %286 : vector<8x32xf32>
    %288 = math.tanh %287 : vector<8x32xf32>
    %289 = arith.mulf %284, %288 : vector<8x32xf32>
    %cst_66 = arith.constant dense<0.000000e+00> : vector<8x128xf32>
    %290 = tpu.matmul %289, %8, %cst_66 {dimension_numbers = #tpu.dot_dimension_numbers<[1], [0], [0], [1], [0, 0, 1, 1], [], []>} : vector<8x32xf32>, vector<32x128xf32>, vector<8x128xf32> -> vector<8x128xf32>
    %291 = arith.addf %290, %258 : vector<8x128xf32>
    %292 = vector.extract_strided_slice %291 {offsets = [0, 0], sizes = [8, 32], strides = [1, 1]} : vector<8x128xf32> to vector<8x32xf32>
    %293 = arith.negf %292 : vector<8x32xf32>
    %294 = math.exp %293 : vector<8x32xf32>
    %cst_67 = arith.constant 1.000000e+00 : f32
    %295 = vector.broadcast %cst_67 : f32 to vector<8x32xf32>
    %296 = arith.addf %295, %294 : vector<8x32xf32>
    %297 = arith.divf %295, %296 : vector<8x32xf32>
    %298 = vector.extract_strided_slice %291 {offsets = [0, 32], sizes = [8, 32], strides = [1, 1]} : vector<8x128xf32> to vector<8x32xf32>
    %299 = arith.negf %298 : vector<8x32xf32>
    %300 = math.exp %299 : vector<8x32xf32>
    %cst_68 = arith.constant 1.000000e+00 : f32
    %301 = vector.broadcast %cst_68 : f32 to vector<8x32xf32>
    %302 = arith.addf %301, %300 : vector<8x32xf32>
    %303 = arith.divf %301, %302 : vector<8x32xf32>
    %304 = vector.extract_strided_slice %291 {offsets = [0, 64], sizes = [8, 32], strides = [1, 1]} : vector<8x128xf32> to vector<8x32xf32>
    %305 = math.tanh %304 : vector<8x32xf32>
    %306 = vector.extract_strided_slice %291 {offsets = [0, 96], sizes = [8, 32], strides = [1, 1]} : vector<8x128xf32> to vector<8x32xf32>
    %307 = arith.negf %306 : vector<8x32xf32>
    %308 = math.exp %307 : vector<8x32xf32>
    %cst_69 = arith.constant 1.000000e+00 : f32
    %309 = vector.broadcast %cst_69 : f32 to vector<8x32xf32>
    %310 = arith.addf %309, %308 : vector<8x32xf32>
    %311 = arith.divf %309, %310 : vector<8x32xf32>
    %312 = arith.mulf %303, %253 : vector<8x32xf32>
    %313 = arith.mulf %297, %305 : vector<8x32xf32>
    %314 = arith.addf %312, %313 : vector<8x32xf32>
    %315 = math.tanh %314 : vector<8x32xf32>
    %316 = arith.mulf %311, %315 : vector<8x32xf32>
    %c5_i32 = arith.constant 5 : i32
    %cst_70 = arith.constant dense<0.000000e+00> : vector<8x128xf32>
    %317 = tpu.matmul %316, %9, %cst_70 {dimension_numbers = #tpu.dot_dimension_numbers<[1], [0], [0], [1], [0, 0, 1, 1], [], []>} : vector<8x32xf32>, vector<32x128xf32>, vector<8x128xf32> -> vector<8x128xf32>
    %318 = vector.broadcast %10 : vector<1x128xf32> to vector<8x128xf32>
    %319 = arith.addf %317, %318 : vector<8x128xf32>
    %c8_i32_71 = arith.constant 8 : i32
    %320 = arith.muli %c5_i32, %c8_i32_71 : i32
    %321 = tpu.assume_multiple %320, 8 : i32
    %322 = arith.index_cast %321 : i32 to index
    %c0_72 = arith.constant 0 : index
    %323 = vector.load %arg10[%322, %c0_72] : memref<64x128xf32, #tpu.memory_space<vmem>>, vector<8x128xf32>
    %cst_73 = arith.constant dense<0.000000e+00> : vector<8x128xf32>
    %324 = tpu.matmul %289, %7, %cst_73 {dimension_numbers = #tpu.dot_dimension_numbers<[1], [0], [0], [1], [0, 0, 1, 1], [], []>} : vector<8x32xf32>, vector<32x128xf32>, vector<8x128xf32> -> vector<8x128xf32>
    %325 = arith.addf %323, %324 : vector<8x128xf32>
    %326 = vector.extract_strided_slice %325 {offsets = [0, 0], sizes = [8, 32], strides = [1, 1]} : vector<8x128xf32> to vector<8x32xf32>
    %327 = arith.negf %326 : vector<8x32xf32>
    %328 = math.exp %327 : vector<8x32xf32>
    %cst_74 = arith.constant 1.000000e+00 : f32
    %329 = vector.broadcast %cst_74 : f32 to vector<8x32xf32>
    %330 = arith.addf %329, %328 : vector<8x32xf32>
    %331 = arith.divf %329, %330 : vector<8x32xf32>
    %332 = vector.extract_strided_slice %325 {offsets = [0, 32], sizes = [8, 32], strides = [1, 1]} : vector<8x128xf32> to vector<8x32xf32>
    %333 = arith.negf %332 : vector<8x32xf32>
    %334 = math.exp %333 : vector<8x32xf32>
    %cst_75 = arith.constant 1.000000e+00 : f32
    %335 = vector.broadcast %cst_75 : f32 to vector<8x32xf32>
    %336 = arith.addf %335, %334 : vector<8x32xf32>
    %337 = arith.divf %335, %336 : vector<8x32xf32>
    %338 = vector.extract_strided_slice %325 {offsets = [0, 64], sizes = [8, 32], strides = [1, 1]} : vector<8x128xf32> to vector<8x32xf32>
    %339 = math.tanh %338 : vector<8x32xf32>
    %340 = vector.extract_strided_slice %325 {offsets = [0, 96], sizes = [8, 32], strides = [1, 1]} : vector<8x128xf32> to vector<8x32xf32>
    %341 = arith.negf %340 : vector<8x32xf32>
    %342 = math.exp %341 : vector<8x32xf32>
    %cst_76 = arith.constant 1.000000e+00 : f32
    %343 = vector.broadcast %cst_76 : f32 to vector<8x32xf32>
    %344 = arith.addf %343, %342 : vector<8x32xf32>
    %345 = arith.divf %343, %344 : vector<8x32xf32>
    %346 = arith.mulf %337, %287 : vector<8x32xf32>
    %347 = arith.mulf %331, %339 : vector<8x32xf32>
    %348 = arith.addf %346, %347 : vector<8x32xf32>
    %349 = math.tanh %348 : vector<8x32xf32>
    %350 = arith.mulf %345, %349 : vector<8x32xf32>
    %cst_77 = arith.constant dense<0.000000e+00> : vector<8x128xf32>
    %351 = tpu.matmul %350, %8, %cst_77 {dimension_numbers = #tpu.dot_dimension_numbers<[1], [0], [0], [1], [0, 0, 1, 1], [], []>} : vector<8x32xf32>, vector<32x128xf32>, vector<8x128xf32> -> vector<8x128xf32>
    %352 = arith.addf %351, %319 : vector<8x128xf32>
    %353 = vector.extract_strided_slice %352 {offsets = [0, 0], sizes = [8, 32], strides = [1, 1]} : vector<8x128xf32> to vector<8x32xf32>
    %354 = arith.negf %353 : vector<8x32xf32>
    %355 = math.exp %354 : vector<8x32xf32>
    %cst_78 = arith.constant 1.000000e+00 : f32
    %356 = vector.broadcast %cst_78 : f32 to vector<8x32xf32>
    %357 = arith.addf %356, %355 : vector<8x32xf32>
    %358 = arith.divf %356, %357 : vector<8x32xf32>
    %359 = vector.extract_strided_slice %352 {offsets = [0, 32], sizes = [8, 32], strides = [1, 1]} : vector<8x128xf32> to vector<8x32xf32>
    %360 = arith.negf %359 : vector<8x32xf32>
    %361 = math.exp %360 : vector<8x32xf32>
    %cst_79 = arith.constant 1.000000e+00 : f32
    %362 = vector.broadcast %cst_79 : f32 to vector<8x32xf32>
    %363 = arith.addf %362, %361 : vector<8x32xf32>
    %364 = arith.divf %362, %363 : vector<8x32xf32>
    %365 = vector.extract_strided_slice %352 {offsets = [0, 64], sizes = [8, 32], strides = [1, 1]} : vector<8x128xf32> to vector<8x32xf32>
    %366 = math.tanh %365 : vector<8x32xf32>
    %367 = vector.extract_strided_slice %352 {offsets = [0, 96], sizes = [8, 32], strides = [1, 1]} : vector<8x128xf32> to vector<8x32xf32>
    %368 = arith.negf %367 : vector<8x32xf32>
    %369 = math.exp %368 : vector<8x32xf32>
    %cst_80 = arith.constant 1.000000e+00 : f32
    %370 = vector.broadcast %cst_80 : f32 to vector<8x32xf32>
    %371 = arith.addf %370, %369 : vector<8x32xf32>
    %372 = arith.divf %370, %371 : vector<8x32xf32>
    %373 = arith.mulf %364, %314 : vector<8x32xf32>
    %374 = arith.mulf %358, %366 : vector<8x32xf32>
    %375 = arith.addf %373, %374 : vector<8x32xf32>
    %376 = math.tanh %375 : vector<8x32xf32>
    %377 = arith.mulf %372, %376 : vector<8x32xf32>
    %c6_i32 = arith.constant 6 : i32
    %cst_81 = arith.constant dense<0.000000e+00> : vector<8x128xf32>
    %378 = tpu.matmul %377, %9, %cst_81 {dimension_numbers = #tpu.dot_dimension_numbers<[1], [0], [0], [1], [0, 0, 1, 1], [], []>} : vector<8x32xf32>, vector<32x128xf32>, vector<8x128xf32> -> vector<8x128xf32>
    %379 = vector.broadcast %10 : vector<1x128xf32> to vector<8x128xf32>
    %380 = arith.addf %378, %379 : vector<8x128xf32>
    %c8_i32_82 = arith.constant 8 : i32
    %381 = arith.muli %c6_i32, %c8_i32_82 : i32
    %382 = tpu.assume_multiple %381, 8 : i32
    %383 = arith.index_cast %382 : i32 to index
    %c0_83 = arith.constant 0 : index
    %384 = vector.load %arg10[%383, %c0_83] : memref<64x128xf32, #tpu.memory_space<vmem>>, vector<8x128xf32>
    %cst_84 = arith.constant dense<0.000000e+00> : vector<8x128xf32>
    %385 = tpu.matmul %350, %7, %cst_84 {dimension_numbers = #tpu.dot_dimension_numbers<[1], [0], [0], [1], [0, 0, 1, 1], [], []>} : vector<8x32xf32>, vector<32x128xf32>, vector<8x128xf32> -> vector<8x128xf32>
    %386 = arith.addf %384, %385 : vector<8x128xf32>
    %387 = vector.extract_strided_slice %386 {offsets = [0, 0], sizes = [8, 32], strides = [1, 1]} : vector<8x128xf32> to vector<8x32xf32>
    %388 = arith.negf %387 : vector<8x32xf32>
    %389 = math.exp %388 : vector<8x32xf32>
    %cst_85 = arith.constant 1.000000e+00 : f32
    %390 = vector.broadcast %cst_85 : f32 to vector<8x32xf32>
    %391 = arith.addf %390, %389 : vector<8x32xf32>
    %392 = arith.divf %390, %391 : vector<8x32xf32>
    %393 = vector.extract_strided_slice %386 {offsets = [0, 32], sizes = [8, 32], strides = [1, 1]} : vector<8x128xf32> to vector<8x32xf32>
    %394 = arith.negf %393 : vector<8x32xf32>
    %395 = math.exp %394 : vector<8x32xf32>
    %cst_86 = arith.constant 1.000000e+00 : f32
    %396 = vector.broadcast %cst_86 : f32 to vector<8x32xf32>
    %397 = arith.addf %396, %395 : vector<8x32xf32>
    %398 = arith.divf %396, %397 : vector<8x32xf32>
    %399 = vector.extract_strided_slice %386 {offsets = [0, 64], sizes = [8, 32], strides = [1, 1]} : vector<8x128xf32> to vector<8x32xf32>
    %400 = math.tanh %399 : vector<8x32xf32>
    %401 = vector.extract_strided_slice %386 {offsets = [0, 96], sizes = [8, 32], strides = [1, 1]} : vector<8x128xf32> to vector<8x32xf32>
    %402 = arith.negf %401 : vector<8x32xf32>
    %403 = math.exp %402 : vector<8x32xf32>
    %cst_87 = arith.constant 1.000000e+00 : f32
    %404 = vector.broadcast %cst_87 : f32 to vector<8x32xf32>
    %405 = arith.addf %404, %403 : vector<8x32xf32>
    %406 = arith.divf %404, %405 : vector<8x32xf32>
    %407 = arith.mulf %398, %348 : vector<8x32xf32>
    %408 = arith.mulf %392, %400 : vector<8x32xf32>
    %409 = arith.addf %407, %408 : vector<8x32xf32>
    %410 = math.tanh %409 : vector<8x32xf32>
    %411 = arith.mulf %406, %410 : vector<8x32xf32>
    %cst_88 = arith.constant dense<0.000000e+00> : vector<8x128xf32>
    %412 = tpu.matmul %411, %8, %cst_88 {dimension_numbers = #tpu.dot_dimension_numbers<[1], [0], [0], [1], [0, 0, 1, 1], [], []>} : vector<8x32xf32>, vector<32x128xf32>, vector<8x128xf32> -> vector<8x128xf32>
    %413 = arith.addf %412, %380 : vector<8x128xf32>
    %414 = vector.extract_strided_slice %413 {offsets = [0, 0], sizes = [8, 32], strides = [1, 1]} : vector<8x128xf32> to vector<8x32xf32>
    %415 = arith.negf %414 : vector<8x32xf32>
    %416 = math.exp %415 : vector<8x32xf32>
    %cst_89 = arith.constant 1.000000e+00 : f32
    %417 = vector.broadcast %cst_89 : f32 to vector<8x32xf32>
    %418 = arith.addf %417, %416 : vector<8x32xf32>
    %419 = arith.divf %417, %418 : vector<8x32xf32>
    %420 = vector.extract_strided_slice %413 {offsets = [0, 32], sizes = [8, 32], strides = [1, 1]} : vector<8x128xf32> to vector<8x32xf32>
    %421 = arith.negf %420 : vector<8x32xf32>
    %422 = math.exp %421 : vector<8x32xf32>
    %cst_90 = arith.constant 1.000000e+00 : f32
    %423 = vector.broadcast %cst_90 : f32 to vector<8x32xf32>
    %424 = arith.addf %423, %422 : vector<8x32xf32>
    %425 = arith.divf %423, %424 : vector<8x32xf32>
    %426 = vector.extract_strided_slice %413 {offsets = [0, 64], sizes = [8, 32], strides = [1, 1]} : vector<8x128xf32> to vector<8x32xf32>
    %427 = math.tanh %426 : vector<8x32xf32>
    %428 = vector.extract_strided_slice %413 {offsets = [0, 96], sizes = [8, 32], strides = [1, 1]} : vector<8x128xf32> to vector<8x32xf32>
    %429 = arith.negf %428 : vector<8x32xf32>
    %430 = math.exp %429 : vector<8x32xf32>
    %cst_91 = arith.constant 1.000000e+00 : f32
    %431 = vector.broadcast %cst_91 : f32 to vector<8x32xf32>
    %432 = arith.addf %431, %430 : vector<8x32xf32>
    %433 = arith.divf %431, %432 : vector<8x32xf32>
    %434 = arith.mulf %425, %375 : vector<8x32xf32>
    %435 = arith.mulf %419, %427 : vector<8x32xf32>
    %436 = arith.addf %434, %435 : vector<8x32xf32>
    %437 = math.tanh %436 : vector<8x32xf32>
    %438 = arith.mulf %433, %437 : vector<8x32xf32>
    %c7_i32 = arith.constant 7 : i32
    %cst_92 = arith.constant dense<0.000000e+00> : vector<8x128xf32>
    %439 = tpu.matmul %438, %9, %cst_92 {dimension_numbers = #tpu.dot_dimension_numbers<[1], [0], [0], [1], [0, 0, 1, 1], [], []>} : vector<8x32xf32>, vector<32x128xf32>, vector<8x128xf32> -> vector<8x128xf32>
    %440 = vector.broadcast %10 : vector<1x128xf32> to vector<8x128xf32>
    %441 = arith.addf %439, %440 : vector<8x128xf32>
    %c8_i32_93 = arith.constant 8 : i32
    %442 = arith.muli %c7_i32, %c8_i32_93 : i32
    %443 = tpu.assume_multiple %442, 8 : i32
    %444 = arith.index_cast %443 : i32 to index
    %c0_94 = arith.constant 0 : index
    %445 = vector.load %arg10[%444, %c0_94] : memref<64x128xf32, #tpu.memory_space<vmem>>, vector<8x128xf32>
    %cst_95 = arith.constant dense<0.000000e+00> : vector<8x128xf32>
    %446 = tpu.matmul %411, %7, %cst_95 {dimension_numbers = #tpu.dot_dimension_numbers<[1], [0], [0], [1], [0, 0, 1, 1], [], []>} : vector<8x32xf32>, vector<32x128xf32>, vector<8x128xf32> -> vector<8x128xf32>
    %447 = arith.addf %445, %446 : vector<8x128xf32>
    %448 = vector.extract_strided_slice %447 {offsets = [0, 0], sizes = [8, 32], strides = [1, 1]} : vector<8x128xf32> to vector<8x32xf32>
    %449 = arith.negf %448 : vector<8x32xf32>
    %450 = math.exp %449 : vector<8x32xf32>
    %cst_96 = arith.constant 1.000000e+00 : f32
    %451 = vector.broadcast %cst_96 : f32 to vector<8x32xf32>
    %452 = arith.addf %451, %450 : vector<8x32xf32>
    %453 = arith.divf %451, %452 : vector<8x32xf32>
    %454 = vector.extract_strided_slice %447 {offsets = [0, 32], sizes = [8, 32], strides = [1, 1]} : vector<8x128xf32> to vector<8x32xf32>
    %455 = arith.negf %454 : vector<8x32xf32>
    %456 = math.exp %455 : vector<8x32xf32>
    %cst_97 = arith.constant 1.000000e+00 : f32
    %457 = vector.broadcast %cst_97 : f32 to vector<8x32xf32>
    %458 = arith.addf %457, %456 : vector<8x32xf32>
    %459 = arith.divf %457, %458 : vector<8x32xf32>
    %460 = vector.extract_strided_slice %447 {offsets = [0, 64], sizes = [8, 32], strides = [1, 1]} : vector<8x128xf32> to vector<8x32xf32>
    %461 = math.tanh %460 : vector<8x32xf32>
    %462 = vector.extract_strided_slice %447 {offsets = [0, 96], sizes = [8, 32], strides = [1, 1]} : vector<8x128xf32> to vector<8x32xf32>
    %463 = arith.negf %462 : vector<8x32xf32>
    %464 = math.exp %463 : vector<8x32xf32>
    %cst_98 = arith.constant 1.000000e+00 : f32
    %465 = vector.broadcast %cst_98 : f32 to vector<8x32xf32>
    %466 = arith.addf %465, %464 : vector<8x32xf32>
    %467 = arith.divf %465, %466 : vector<8x32xf32>
    %468 = arith.mulf %459, %409 : vector<8x32xf32>
    %469 = arith.mulf %453, %461 : vector<8x32xf32>
    %470 = arith.addf %468, %469 : vector<8x32xf32>
    %471 = math.tanh %470 : vector<8x32xf32>
    %472 = arith.mulf %467, %471 : vector<8x32xf32>
    %cst_99 = arith.constant dense<0.000000e+00> : vector<8x128xf32>
    %473 = tpu.matmul %472, %8, %cst_99 {dimension_numbers = #tpu.dot_dimension_numbers<[1], [0], [0], [1], [0, 0, 1, 1], [], []>} : vector<8x32xf32>, vector<32x128xf32>, vector<8x128xf32> -> vector<8x128xf32>
    %474 = arith.addf %473, %441 : vector<8x128xf32>
    %475 = vector.extract_strided_slice %474 {offsets = [0, 0], sizes = [8, 32], strides = [1, 1]} : vector<8x128xf32> to vector<8x32xf32>
    %476 = arith.negf %475 : vector<8x32xf32>
    %477 = math.exp %476 : vector<8x32xf32>
    %cst_100 = arith.constant 1.000000e+00 : f32
    %478 = vector.broadcast %cst_100 : f32 to vector<8x32xf32>
    %479 = arith.addf %478, %477 : vector<8x32xf32>
    %480 = arith.divf %478, %479 : vector<8x32xf32>
    %481 = vector.extract_strided_slice %474 {offsets = [0, 32], sizes = [8, 32], strides = [1, 1]} : vector<8x128xf32> to vector<8x32xf32>
    %482 = arith.negf %481 : vector<8x32xf32>
    %483 = math.exp %482 : vector<8x32xf32>
    %cst_101 = arith.constant 1.000000e+00 : f32
    %484 = vector.broadcast %cst_101 : f32 to vector<8x32xf32>
    %485 = arith.addf %484, %483 : vector<8x32xf32>
    %486 = arith.divf %484, %485 : vector<8x32xf32>
    %487 = vector.extract_strided_slice %474 {offsets = [0, 64], sizes = [8, 32], strides = [1, 1]} : vector<8x128xf32> to vector<8x32xf32>
    %488 = math.tanh %487 : vector<8x32xf32>
    %489 = vector.extract_strided_slice %474 {offsets = [0, 96], sizes = [8, 32], strides = [1, 1]} : vector<8x128xf32> to vector<8x32xf32>
    %490 = arith.negf %489 : vector<8x32xf32>
    %491 = math.exp %490 : vector<8x32xf32>
    %cst_102 = arith.constant 1.000000e+00 : f32
    %492 = vector.broadcast %cst_102 : f32 to vector<8x32xf32>
    %493 = arith.addf %492, %491 : vector<8x32xf32>
    %494 = arith.divf %492, %493 : vector<8x32xf32>
    %495 = arith.mulf %486, %436 : vector<8x32xf32>
    %496 = arith.mulf %480, %488 : vector<8x32xf32>
    %497 = arith.addf %495, %496 : vector<8x32xf32>
    %498 = math.tanh %497 : vector<8x32xf32>
    %499 = arith.mulf %494, %498 : vector<8x32xf32>
    %c8_i32_103 = arith.constant 8 : i32
    %c0_104 = arith.constant 0 : index
    %c0_105 = arith.constant 0 : index
    %500 = vector.load %arg7[%c0_104, %c0_105] : memref<32x1xf32, #tpu.memory_space<vmem>>, vector<32x1xf32>
    %cst_106 = arith.constant dense<0.000000e+00> : vector<8x1xf32>
    %501 = tpu.matmul %499, %500, %cst_106 {dimension_numbers = #tpu.dot_dimension_numbers<[1], [0], [0], [1], [0, 0, 1, 1], [], []>} : vector<8x32xf32>, vector<32x1xf32>, vector<8x1xf32> -> vector<8x1xf32>
    %c0_107 = arith.constant 0 : index
    %c0_108 = arith.constant 0 : index
    %502 = vector.load %arg8[%c0_107, %c0_108] : memref<1x1xf32, #tpu.memory_space<vmem>>, vector<1x1xf32>
    %503 = vector.broadcast %502 : vector<1x1xf32> to vector<8x1xf32>
    %504 = arith.addf %501, %503 : vector<8x1xf32>
    %c0_109 = arith.constant 0 : index
    %c0_110 = arith.constant 0 : index
    %505 = vector.load %arg9[%c0_109, %c0_110] : memref<8x1xf32, #tpu.memory_space<vmem>>, vector<8x1xf32>
    tpu.vector_store %arg9[%c0_109, %c0_110], %504 {strides = array<i32>} : memref<8x1xf32, #tpu.memory_space<vmem>>, vector<8x1xf32>,
    return
  }
}

</mosaic_0001>

<bundles_post_ra>
// kernel: lstm_model_forward.1
= control target key start
LH: loop header
LB: loop body
LE: loop exit
PB: predicated region body
PF: predicated region fallthrough
CT: control target
= control target key end

     0   :  { %s3864_s0 = inlined_call_operand.vmem [shape: f32[64,128], index: 0, kind: input, shape index: {}]   ;;  %s3865_s1 = inlined_call_operand.vmem [shape: f32[128,128], index: 1, kind: input, shape index: {}]   ;;  %s3866_s2 = inlined_call_operand.hbm [shape: f32[32,128], index: 2, kind: input, shape index: {}]   ;;  %s3867_s3 = inlined_call_operand.vmem [shape: f32[1,128], index: 3, kind: input, shape index: {}]   ;;  %s3868_s4 = inlined_call_operand.hbm [shape: f32[32,128], index: 4, kind: input, shape index: {}]   ;;  %s3869_s5 = inlined_call_operand.hbm [shape: f32[32,128], index: 5, kind: input, shape index: {}]   ;;  %s3870_s6 = inlined_call_operand.vmem [shape: f32[1,128], index: 6, kind: input, shape index: {}]   ;;  %s3871_s7 = inlined_call_operand.vmem [shape: f32[32,1], index: 7, kind: input, shape index: {}]   ;;  %s3872_s8 = inlined_call_operand.<no memory space> [shape: f32[1,1], index: 8, kind: input, shape index: {}]   ;;  %s3873_s9 = inlined_call_operand.vmem [shape: f32[8,1], index: 9, kind: output, shape index: {}]  }
   0x1   :  { %v14_v0 = vstv %s3872_s8 }
   0x2   :  { %15 = vst [vmem:[#allocation3] sm:$0x1] %v14_v0 }
   0x3   :  { %16 = vsyncpa [#allocation5], 0 }
   0x4   :  { %17 = vsyncpa [#allocation7], 0  ;;  %s3223_s11 = smov [#allocation6]   ;;  %s3224_s13 = smov [#allocation4]  }
   0x5   :  { %s41_s12 = sshll.u32 %s3223_s11, 4  ;;  %s27_s14 = sshll.u32 %s3224_s13, 4  ;;  %s42_s12 = int_to_ptr.vmem [resolvable:$true] %s41_s12  ;;  %s28_s14 = int_to_ptr.vmem [resolvable:$true] %s27_s14 }
   0x6   :  { %s3167_s15 = scalar_lea.vmem %s42_s12, 512  ;;  %p3172_p1 = scmp.lt.s32.totalorder %s42_s12, %s42_s12 }
   0x7   :  { %p3168_p0 = scmp.ne.s32.totalorder %s42_s12, %s3167_s15  ;;  %p3173_p2 = scmp.lt.s32.totalorder %s3167_s15, %s3167_s15 }
   0x9   :  { %p3174_p3 = por %p3173_p2, %p3172_p1 }
   0xb   :  { %p3175_p4 = pnand %p3174_p3, %p3168_p0 }
   0xd   :  { %3178 = shalt.err (!%p3175_p4)
}
   0xe   :  { %s3225_s16 = smov 128   ;;  %s3226_s17 = smov 8  }
   0xf   :  { %47 = dma.hbm_to_vmem [thread:$0]  %s3868_s4, 512, %s42_s12, [#allocation7], %s3225_s16, %s3225_s16, %s3226_s17  }
  0x10   :  { %s3187_s19 = scalar_lea.vmem %s28_s14, 512  ;;  %p3192_p6 = scmp.lt.s32.totalorder %s28_s14, %s28_s14 }
  0x11   :  { %p3188_p5 = scmp.ne.s32.totalorder %s28_s14, %s3187_s19  ;;  %p3193_p7 = scmp.lt.s32.totalorder %s3187_s19, %s3187_s19 }
  0x13   :  { %p3194_p8 = por %p3193_p7, %p3192_p6 }
  0x15   :  { %p3195_p9 = pnand %p3194_p8, %p3188_p5 }
  0x17   :  { %3198 = shalt.err (!%p3195_p9)
}
  0x18   :  { %33 = dma.hbm_to_vmem [thread:$0]  %s3866_s2, 512, %s28_s14, [#allocation5], %s3225_s16, %s3225_s16, %s3226_s17  }
  0x19   :  { %s3227_s22 = smov [#allocation8]  }
  0x1a   :  { %s53_s23 = sshll.u32 %s3227_s22, 4  ;;  %s54_s23 = int_to_ptr.vmem [resolvable:$true] %s53_s23 }
  0x1b   :  { %s3207_s24 = scalar_lea.vmem %s54_s23, 512  ;;  %p3212_p11 = scmp.lt.s32.totalorder %s54_s23, %s54_s23 }
  0x1c   :  { %p3208_p10 = scmp.ne.s32.totalorder %s54_s23, %s3207_s24  ;;  %p3213_p12 = scmp.lt.s32.totalorder %s3207_s24, %s3207_s24 }
  0x1e   :  { %p3214_p13 = por %p3213_p12, %p3212_p11 }
  0x20   :  { %p3215_p0 = pnand %p3214_p13, %p3208_p10 }
  0x22   :  { %3218 = shalt.err (!%p3215_p0)
}
  0x23   :  { %59 = dma.hbm_to_vmem [thread:$0]  %s3869_s5, 512, %s54_s23, [#allocation7], %s3225_s16, %s3225_s16, %s3226_s17  }
  0x24   :  { %3219 = dma.done.wait [#allocation5], 512  }
  0x25   :  { %3220 = vsyncadd [#allocation5], 4294966784 }
  0x26   :  { %3221 = dma.done.wait [#allocation7], 1024  }
  0x27   :  { %3222 = vsyncadd [#allocation7], 4294966272  ;;  %v3228_v1 = vmov 0.0   ;;  %vm3229_vm0 = vmmov 0   ;;  %v98_v2 = vld [vmem:[%s3865_s1 + $0x78] sm:$0xff]  ;;  %v97_v3 = vld [vmem:[%s3865_s1 + $0x70] sm:$0xff] }
  0x28   :  { %2733 = vmatprep.subr.mxu1 %v3228_v1  ;;  %2741 = vmatprep.mubr.msk.f32.mxu1 %vm3229_vm0, %v3228_v1  ;;  %v96_v4 = vld [vmem:[%s3865_s1 + $0x68] sm:$0xff]  ;;  %v3306_v5 = vld [vmem:[#allocation8 + $0x18] sm:$0xff]  ;;  %v3312_v7 = vld [vmem:[#allocation8 + $0x10] sm:$0xff]  ;;  %s3230_s15 = smov 64   ;;  %s3231_s16 = smov 32   ;;  %vm238_vm1 = vcmask 261120  }
  0x29   :  { %2689 = vmatprep.subr.mxu0 %v98_v2  ;;  %v95_v6 = vld [vmem:[%s3865_s1 + $0x60] sm:$0xff]  ;;  %2734 = vmatpush3.msra.mxu1 %v3306_v5  ;;  %v3315_v8 = vld [vmem:[#allocation8 + $0x8] sm:$0xff]  ;;  %v94_v9 = vld [vmem:[%s3865_s1 + $0x58] sm:$0xff]  ;;  %vm2490_vm2 = vcmask 7168  }
  0x2a   :  { %2690 = vmatpush3.msra.mxu0 %v98_v2  ;;  %2735 = vmatprep.subr.mxu1 %v3228_v1  ;;  %v3322_v10 = vld [vmem:[#allocation8] sm:$0xff]  ;;  %v93_v11 = vld [vmem:[%s3865_s1 + $0x50] sm:$0xff]  ;;  %v3333_v13 = vld [vmem:[#allocation4 + $0x18] sm:$0xff] }
  0x2b   :  { %2691 = vmatprep.subr.mxu0 %v97_v3  ;;  %2736 = vmatpush3.msra.mxu1 %v3312_v7  ;;  %v92_v12 = vld [vmem:[%s3865_s1 + $0x48] sm:$0xff]  ;;  %v91_v14 = vld [vmem:[%s3865_s1 + $0x40] sm:$0xff]  ;;  %v3340_v15 = vld [vmem:[#allocation4 + $0x10] sm:$0xff] }
  0x2c   :  { %2692 = vmatpush3.msra.mxu0 %v97_v3  ;;  %2737 = vmatprep.subr.mxu1 %v3228_v1  ;;  %v90_v16 = vld [vmem:[%s3865_s1 + $0x38] sm:$0xff]  ;;  %v75_v17 = vld [vmem:[%s3864_s0] sm:$0xff]  ;;  %v3351_v18 = vld [vmem:[#allocation4 + $0x8] sm:$0xff] }
  0x2d   :  { %2693 = vmatprep.subr.mxu0 %v96_v4  ;;  %2738 = vmatpush3.msra.mxu1 %v3315_v8  ;;  %v89_v19 = vld [vmem:[%s3865_s1 + $0x30] sm:$0xff]  ;;  %v3357_v20 = vld [vmem:[#allocation4] sm:$0xff]  ;;  %v86_v23 = vld [vmem:[%s3865_s1 + $0x18] sm:$0xff] }
  0x2e   :  { %2694 = vmatpush3.msra.mxu0 %v96_v4  ;;  %2739 = vmatprep.subr.mxu1 %v3228_v1  ;;  %v88_v21 = vld [vmem:[%s3865_s1 + $0x28] sm:$0xff]  ;;  %v87_v22 = vld [vmem:[%s3865_s1 + $0x20] sm:$0xff]  ;;  %v85_v24 = vld [vmem:[%s3865_s1 + $0x10] sm:$0xff] }
  0x2f   :  { %2695 = vmatprep.subr.mxu0 %v95_v6  ;;  %2740 = vmatpush3.msra.mxu1 %v3322_v10  ;;  %v84_v25 = vld [vmem:[%s3865_s1 + $0x8] sm:$0xff]  ;;  %v83_v26 = vld [vmem:[%s3865_s1] sm:$0xff]  ;;  %v3407_v48 = vld [vmem:[#allocation6 + $0x10] sm:$0xff] }
  0x30   :  { %2696 = vmatpush3.msra.mxu0 %v95_v6  ;;  %2744 = vmatprep.subr.mxu1 %v3228_v1  ;;  %v76_v27 = vld [vmem:[%s3864_s0 + $0x8] sm:$0xff]  ;;  %v3397_v33 = vld [vmem:[%s3867_s3] ss:$0 sm:$0xff] }
  0x31   :  { %2697 = vmatprep.subr.mxu0 %v94_v9  ;;  %2742 = vmatmul.mubr.f32.vlgmr.msra.gmra.mxu1 %v3228_v1  ;;  %v3405_v47 = vld [vmem:[#allocation6 + $0x18] sm:$0xff]  ;;  %v3412_v49 = vld [vmem:[#allocation6 + $0x8] sm:$0xff]  ;;  %v3418_v50 = vld [vmem:[#allocation6] sm:$0xff] }
  0x32   :  { %2698 = vmatpush3.msra.mxu0 %v94_v9  ;;  %2745 = vmatpush3.msra.mxu1 %v3333_v13  ;;  %v3445_v55 = vld [vmem:[%s3870_s6] ss:$0 sm:$0xff] }
  0x33   :  { %2699 = vmatprep.subr.mxu0 %v93_v11  ;;  %2746 = vmatprep.subr.mxu1 %v3228_v1 }
  0x34   :  { %2700 = vmatpush3.msra.mxu0 %v93_v11  ;;  %2747 = vmatpush3.msra.mxu1 %v3340_v15 }
  0x35   :  { %2701 = vmatprep.subr.mxu0 %v92_v12  ;;  %2748 = vmatprep.subr.mxu1 %v3228_v1 }
  0x36   :  { %2702 = vmatpush3.msra.mxu0 %v92_v12  ;;  %2721 = vmatprep.mubr.f32.mxu0 %v75_v17 }
  0x37   :  { %2703 = vmatprep.subr.mxu0 %v91_v14  ;;  %2749 = vmatpush3.msra.mxu1 %v3351_v18 }
  0x38   :  { %2704 = vmatpush3.msra.mxu0 %v91_v14  ;;  %2750 = vmatprep.subr.mxu1 %v3228_v1 }
  0x39   :  { %2705 = vmatprep.subr.mxu0 %v90_v16  ;;  %2751 = vmatpush3.msra.mxu1 %v3357_v20 }
  0x3a   :  { %2706 = vmatpush3.msra.mxu0 %v90_v16  ;;  %2752 = vmatprep.mubr.msk.f32.mxu1 %vm3229_vm0, %v3228_v1 }
  0x3b   :  { %2707 = vmatprep.subr.mxu0 %v89_v19  ;;  %2753 = vmatmul.mubr.f32.vlgmr.msra.gmra.mxu1 %v3228_v1 }
  0x3c   :  { %2708 = vmatpush3.msra.mxu0 %v89_v19  ;;  %2755 = vmatprep.subr.mxu1 %v3228_v1 }
  0x3d   :  { %2709 = vmatprep.subr.mxu0 %v88_v21  ;;  %2763 = vmatprep.mubr.msk.f32.mxu1 %vm3229_vm0, %v3228_v1 }
  0x3e   :  { %2710 = vmatpush3.msra.mxu0 %v88_v21  ;;  %2756 = vmatpush3.msra.mxu1 %v3405_v47 }
  0x3f   :  { %2711 = vmatprep.subr.mxu0 %v87_v22  ;;  %2757 = vmatprep.subr.mxu1 %v3228_v1 }
  0x40   :  { %2712 = vmatpush3.msra.mxu0 %v87_v22  ;;  %2758 = vmatpush3.msra.mxu1 %v3407_v48 }
  0x41   :  { %2713 = vmatprep.subr.mxu0 %v86_v23  ;;  %2759 = vmatprep.subr.mxu1 %v3228_v1 }
  0x42   :  { %2714 = vmatpush3.msra.mxu0 %v86_v23  ;;  %2760 = vmatpush3.msra.mxu1 %v3412_v49 }
  0x43   :  { %2715 = vmatprep.subr.mxu0 %v85_v24  ;;  %2761 = vmatprep.subr.mxu1 %v3228_v1 }
  0x44   :  { %2716 = vmatpush3.msra.mxu0 %v85_v24  ;;  %2762 = vmatpush3.msra.mxu1 %v3418_v50 }
  0x45   :  { %2717 = vmatprep.subr.mxu0 %v84_v25  ;;  %2766 = vmatprep.subr.mxu1 %v3228_v1 }
  0x46   :  { %2718 = vmatpush3.msra.mxu0 %v84_v25 }
  0x47   :  { %2719 = vmatprep.subr.mxu0 %v83_v26 }
  0x48   :  { %2720 = vmatpush3.msra.mxu0 %v83_v26 }
  0x49   :  { %2722 = vmatmul.mubr.f32.vlgmr.msra.gmra.mxu0 %v76_v27  ;;  %2788 = vmatprep.subr.mxu0 %v3228_v1 }
  0x4a   :  { %2789 = vmatpush3.msra.mxu0 %v3405_v47 }
  0x4b   :  { %2790 = vmatprep.subr.mxu0 %v3228_v1 }
  0x4c   :  { %2791 = vmatpush3.msra.mxu0 %v3407_v48 }
  0x4d   :  { %2792 = vmatprep.subr.mxu0 %v3228_v1 }
  0x4e   :  { %2793 = vmatpush3.msra.mxu0 %v3412_v49 }
  0x4f   :  { %2794 = vmatprep.subr.mxu0 %v3228_v1 }
  0x50   :  { %2795 = vmatpush3.msra.mxu0 %v3418_v50 }
  0x51   :  { %2810 = vmatprep.subr.mxu0 %v3228_v1 }
  0xf1   :  { %v3390_v28 = vpop.f32.mrf.mxu1 }
  0xf2   :  { %v309_v56 = vadd.f32 %v3445_v55, %v3390_v28 }
  0xf3   :  { %v2743_v29 = vpop.f32.mrf.mxu1 }
  0xfb   :  { %v379_v30 = vpop.f32.mrf.mxu1 }
  0xfd   :  { %v2754_v31 = vpop.f32.mrf.mxu1 }
 0x109   :  { %v3392_v32 = vpop.f32.mrf.mxu0 }
 0x10a   :  { %v178_v21 = vadd.f32 %v3392_v32, %v3397_v33 }
 0x10b   :  { %v172_v34 = vpop.f32.mrf.mxu0 }
 0x10c   :  { %v173_v35 = vadd.f32 %v3397_v33, %v172_v34 }
 0x10e   :  { %v383_v36 = vadd.f32 %v379_v30, %v173_v35 }
 0x110   :  { %3017 = vtanh.f32 %v383_v36  ;;  %v2500_v38 = vmul.f32 -1.442695, %v383_v36  ;;  %v77_v36 = vld [vmem:[%s3864_s0 + $0x10] sm:$0xff] }
 0x111   :  { %2724 = vmatprep.mubr.f32.mxu0 %v77_v36 }
 0x112   :  { %3019 = vpow2.f32 %v2500_v38  ;;  %v79_v38 = vld [vmem:[%s3864_s0 + $0x20] sm:$0xff] }
 0x11d   :  { %v3018_v37 = vpop.eup %3017 }
 0x11e   :  { %393 = vrot.lane.b32.xlu0 %v3018_v37, %s3230_s15  ;;  %v78_v37 = vld [vmem:[%s3864_s0 + $0x18] sm:$0xff] }
 0x11f   :  { %v3020_v39 = vpop.eup %3019  ;;  %2725 = vmatmul.mubr.f32.gmra.mxu0 %v78_v37 }
 0x120   :  { %v387_v40 = vadd.f32 1.0, %v3020_v39  ;;  %2727 = vmatprep.mubr.f32.mxu0 %v79_v38  ;;  %v80_v39 = vld [vmem:[%s3864_s0 + $0x28] sm:$0xff] }
 0x122   :  { %3021 = vrcp.f32 %v387_v40  ;;  %v81_v40 = vld [vmem:[%s3864_s0 + $0x30] sm:$0xff] }
 0x123   :  { %2728 = vmatmul.mubr.f32.gmra.mxu0 %v80_v39 }
 0x124   :  { %2730 = vmatprep.mubr.f32.mxu0 %v81_v40 }
 0x12f   :  { %v3022_v41 = vpop.eup %3021 }
 0x130   :  { %v391_v44 = vmul.f32 0.0, %v3022_v41 }
 0x190   :  { %v394_v42 = vpop.permute.xlu0 %393 }
 0x191   :  { %v396_v43 = vmul.f32 %v3022_v41, %v394_v42 }
 0x193   :  { %398 = vrot.lane.b32.xlu0 %v396_v43, %s3231_s16 }
 0x205   :  { %v399_v45 = vpop.permute.xlu0 %398 }
 0x206   :  { %v3402_v46 = vadd.f32 %v399_v45, %v391_v44 }
 0x208   :  { %3023 = vtanh.f32 %v3402_v46 }
 0x215   :  { %v3024_v51 = vpop.eup %3023 }
 0x216   :  { %404 = vrot.lane.b32.xlu1 %v3024_v51, %s3230_s15 }
 0x288   :  { %v405_v52 = vpop.permute.xlu1 %404 }
 0x289   :  { %v407_v53 = vmul.f32 %v3022_v41, %v405_v52  ;;  %v82_v41 = vld [vmem:[%s3864_s0 + $0x38] sm:$0xff] }
 0x28a   :  { %2731 = vmatmul.mubr.f32.gmra.mxu0 %v82_v41 }
 0x28b   :  { %409 = vrot.lane.b32.xlu1 %v407_v53, %s3231_s16  ;;  %2796 = vmatprep.mubr.msk.f32.mxu0 %vm3229_vm0, %v3228_v1 }
 0x2fd   :  { %v410_v54 = vpop.permute.xlu1 %409 }
 0x2fe   :  { %2764 = vmatmul.mubr.msk.f32.vlgmr.msra.gmra.mxu1 %vm238_vm1, %v410_v54 }
 0x2ff   :  { %2767 = vmatpush3.msra.mxu1 %v3306_v5  ;;  %2774 = vmatprep.mubr.msk.f32.mxu1 %vm3229_vm0, %v3228_v1 }
 0x300   :  { %2768 = vmatprep.subr.mxu1 %v3228_v1 }
 0x301   :  { %2769 = vmatpush3.msra.mxu1 %v3312_v7 }
 0x302   :  { %2770 = vmatprep.subr.mxu1 %v3228_v1 }
 0x303   :  { %2771 = vmatpush3.msra.mxu1 %v3315_v8 }
 0x304   :  { %2772 = vmatprep.subr.mxu1 %v3228_v1 }
 0x305   :  { %2773 = vmatpush3.msra.mxu1 %v3322_v10 }
 0x306   :  { %2777 = vmatprep.subr.mxu1 %v3228_v1 }
 0x3be   :  { %v479_v57 = vpop.f32.mrf.mxu1 }
 0x3bf   :  { %v480_v58 = vadd.f32 %v479_v57, %v309_v56 }
 0x3c0   :  { %v2765_v59 = vpop.f32.mrf.mxu1 }
 0x3c1   :  { %3025 = vtanh.f32 %v480_v58  ;;  %v2502_v61 = vmul.f32 -1.442695, %v480_v58 }
 0x3c3   :  { %3027 = vpow2.f32 %v2502_v61 }
 0x3ce   :  { %v3026_v60 = vpop.eup %3025 }
 0x3cf   :  { %492 = vrot.lane.b32.xlu0 %v3026_v60, %s3230_s15 }
 0x3d0   :  { %v3028_v62 = vpop.eup %3027 }
 0x3d1   :  { %v486_v63 = vadd.f32 1.0, %v3028_v62 }
 0x3d3   :  { %3029 = vrcp.f32 %v486_v63 }
 0x3e0   :  { %v3030_v0 = vpop.eup %3029 }
 0x3e1   :  { %v490_v4 = vmul.f32 0.0, %v3030_v0 }
 0x441   :  { %v493_v2 = vpop.permute.xlu0 %492 }
 0x442   :  { %v495_v3 = vmul.f32 %v3030_v0, %v493_v2 }
 0x444   :  { %497 = vrot.lane.b32.xlu1 %v495_v3, %s3231_s16 }
 0x4b6   :  { %v498_v6 = vpop.permute.xlu1 %497 }
 0x4b7   :  { %v3451_v9 = vadd.f32 %v498_v6, %v490_v4 }
 0x4b9   :  { %3031 = vtanh.f32 %v3451_v9 }
 0x4c6   :  { %v3032_v11 = vpop.eup %3031 }
 0x4c7   :  { %503 = vrot.lane.b32.xlu0 %v3032_v11, %s3230_s15 }
 0x539   :  { %v504_v12 = vpop.permute.xlu0 %503 }
 0x53a   :  { %v506_v14 = vmul.f32 %v3030_v0, %v504_v12 }
 0x53c   :  { %508 = vrot.lane.b32.xlu1 %v506_v14, %s3231_s16 }
 0x5ae   :  { %v509_v16 = vpop.permute.xlu1 %508 }
 0x5af   :  { %2775 = vmatmul.mubr.msk.f32.vlgmr.msra.gmra.mxu1 %vm238_vm1, %v509_v16 }
 0x5b0   :  { %2778 = vmatpush3.msra.mxu1 %v3333_v13  ;;  %2785 = vmatprep.mubr.msk.f32.mxu1 %vm3229_vm0, %v3228_v1 }
 0x5b1   :  { %2779 = vmatprep.subr.mxu1 %v3228_v1 }
 0x5b2   :  { %2780 = vmatpush3.msra.mxu1 %v3340_v15 }
 0x5b3   :  { %2781 = vmatprep.subr.mxu1 %v3228_v1 }
 0x5b4   :  { %2782 = vmatpush3.msra.mxu1 %v3351_v18 }
 0x5b5   :  { %2783 = vmatprep.subr.mxu1 %v3228_v1 }
 0x5b6   :  { %2784 = vmatpush3.msra.mxu1 %v3357_v20 }
 0x5b7   :  { %2786 = vmatmul.mubr.msk.f32.vlgmr.msra.gmra.mxu1 %vm238_vm1, %v410_v54  ;;  %2799 = vmatprep.subr.mxu1 %v3228_v1 }
 0x5b8   :  { %2800 = vmatpush3.msra.mxu1 %v3306_v5  ;;  %2807 = vmatprep.mubr.msk.f32.mxu1 %vm3229_vm0, %v3228_v1 }
 0x5b9   :  { %2801 = vmatprep.subr.mxu1 %v3228_v1 }
 0x5ba   :  { %2802 = vmatpush3.msra.mxu1 %v3312_v7 }
 0x5bb   :  { %2803 = vmatprep.subr.mxu1 %v3228_v1 }
 0x5bc   :  { %2804 = vmatpush3.msra.mxu1 %v3315_v8 }
 0x5bd   :  { %2805 = vmatprep.subr.mxu1 %v3228_v1 }
 0x5be   :  { %2806 = vmatpush3.msra.mxu1 %v3322_v10 }
 0x5bf   :  { %2821 = vmatprep.subr.mxu1 %v3228_v1 }
 0x66f   :  { %v3478_v17 = vpop.f32.mrf.mxu1 }
 0x670   :  { %v579_v57 = vadd.f32 %v3445_v55, %v3478_v17 }
 0x671   :  { %v2776_v19 = vpop.f32.mrf.mxu1 }
 0x677   :  { %v650_v22 = vpop.f32.mrf.mxu1 }
 0x678   :  { %v654_v23 = vadd.f32 %v650_v22, %v178_v21 }
 0x679   :  { %v2787_v24 = vpop.f32.mrf.mxu1 }
 0x67a   :  { %3033 = vtanh.f32 %v654_v23  ;;  %v2505_v26 = vmul.f32 -1.442695, %v654_v23 }
 0x67c   :  { %3035 = vpow2.f32 %v2505_v26 }
 0x687   :  { %v3034_v25 = vpop.eup %3033 }
 0x688   :  { %664 = vrot.lane.b32.xlu0 %v3034_v25, %s3230_s15 }
 0x689   :  { %v3036_v27 = vpop.eup %3035 }
 0x68a   :  { %v658_v28 = vadd.f32 1.0, %v3036_v27 }
 0x68c   :  { %3037 = vrcp.f32 %v658_v28 }
 0x699   :  { %v3038_v29 = vpop.eup %3037 }
 0x69a   :  { %v662_v34 = vmul.f32 %v3038_v29, %v3402_v46  ;;  %v3532_v46 = vpop.f32.mrf.mxu0 }
 0x69c   :  { %v182_v51 = vpop.f32.mrf.mxu0 }
 0x69d   :  { %v183_v61 = vadd.f32 %v3397_v33, %v182_v51 }
 0x69e   :  { %v3534_v52 = vpop.f32.mrf.mxu0 }
 0x6a0   :  { %v3536_v53 = vpop.f32.mrf.mxu0 }
 0x6a2   :  { %v3538_v54 = vpop.f32.mrf.mxu0 }
 0x6a4   :  { %v3540_v56 = vpop.f32.mrf.mxu0 }
 0x6fa   :  { %v665_v30 = vpop.permute.xlu0 %664 }
 0x6fb   :  { %v667_v31 = vmul.f32 %v3038_v29, %v665_v30 }
 0x6fd   :  { %669 = vrot.lane.b32.xlu1 %v667_v31, %s3231_s16 }
 0x76f   :  { %v670_v32 = vpop.permute.xlu1 %669 }
 0x770   :  { %v3485_v35 = vadd.f32 %v670_v32, %v662_v34 }
 0x772   :  { %3039 = vtanh.f32 %v3485_v35 }
 0x77f   :  { %v3040_v42 = vpop.eup %3039 }
 0x780   :  { %675 = vrot.lane.b32.xlu0 %v3040_v42, %s3230_s15 }
 0x7f2   :  { %v676_v43 = vpop.permute.xlu0 %675 }
 0x7f3   :  { %v678_v44 = vmul.f32 %v3038_v29, %v676_v43 }
 0x7f5   :  { %680 = vrot.lane.b32.xlu1 %v678_v44, %s3231_s16 }
 0x867   :  { %v681_v45 = vpop.permute.xlu1 %680 }
 0x868   :  { %2797 = vmatmul.mubr.msk.f32.vlgmr.msra.gmra.mxu0 %vm238_vm1, %v681_v45 }
 0x869   :  { %2811 = vmatpush3.msra.mxu0 %v3333_v13  ;;  %2818 = vmatprep.mubr.msk.f32.mxu0 %vm3229_vm0, %v3228_v1 }
 0x86a   :  { %2812 = vmatprep.subr.mxu0 %v3228_v1 }
 0x86b   :  { %2813 = vmatpush3.msra.mxu0 %v3340_v15 }
 0x86c   :  { %2814 = vmatprep.subr.mxu0 %v3228_v1 }
 0x86d   :  { %2815 = vmatpush3.msra.mxu0 %v3351_v18 }
 0x86e   :  { %2816 = vmatprep.subr.mxu0 %v3228_v1 }
 0x86f   :  { %2817 = vmatpush3.msra.mxu0 %v3357_v20 }
 0x870   :  { %2819 = vmatmul.mubr.msk.f32.vlgmr.msra.gmra.mxu0 %vm238_vm1, %v681_v45  ;;  %2832 = vmatprep.subr.mxu0 %v3228_v1  ;;  %v188_v45 = vadd.f32 %v3532_v46, %v3397_v33 }
 0x871   :  { %2833 = vmatpush3.msra.mxu0 %v3306_v5  ;;  %2840 = vmatprep.mubr.msk.f32.mxu0 %vm3229_vm0, %v3228_v1 }
 0x872   :  { %2834 = vmatprep.subr.mxu0 %v3228_v1 }
 0x873   :  { %2835 = vmatpush3.msra.mxu0 %v3312_v7 }
 0x874   :  { %2836 = vmatprep.subr.mxu0 %v3228_v1 }
 0x875   :  { %2837 = vmatpush3.msra.mxu0 %v3315_v8 }
 0x876   :  { %2838 = vmatprep.subr.mxu0 %v3228_v1 }
 0x877   :  { %2839 = vmatpush3.msra.mxu0 %v3322_v10 }
 0x878   :  { %2854 = vmatprep.subr.mxu0 %v3228_v1 }
 0x928   :  { %v750_v58 = vpop.f32.mrf.mxu0 }
 0x929   :  { %v751_v59 = vadd.f32 %v750_v58, %v579_v57 }
 0x92a   :  { %v2798_v60 = vpop.f32.mrf.mxu0 }
 0x92b   :  { %3041 = vtanh.f32 %v751_v59  ;;  %v2507_v4 = vmul.f32 -1.442695, %v751_v59 }
 0x930   :  { %v921_v62 = vpop.f32.mrf.mxu0 }
 0x931   :  { %v925_v63 = vadd.f32 %v921_v62, %v183_v61 }
 0x932   :  { %v2820_v0 = vpop.f32.mrf.mxu0 }
 0x933   :  { %3043 = vtanh.f32 %v925_v63  ;;  %v2510_v6 = vmul.f32 -1.442695, %v925_v63 }
 0x934   :  { %3045 = vpow2.f32 %v2507_v4 }
 0x935   :  { %3047 = vpow2.f32 %v2510_v6 }
 0x938   :  { %v3042_v2 = vpop.eup %3041 }
 0x939   :  { %763 = vrot.lane.b32.xlu0 %v3042_v2, %s3230_s15 }
 0x940   :  { %v3044_v3 = vpop.eup %3043 }
 0x941   :  { %935 = vrot.lane.b32.xlu1 %v3044_v3, %s3230_s15  ;;  %v3046_v11 = vpop.eup %3045 }
 0x942   :  { %v757_v12 = vadd.f32 1.0, %v3046_v11  ;;  %v3048_v14 = vpop.eup %3047 }
 0x943   :  { %v929_v16 = vadd.f32 1.0, %v3048_v14 }
 0x944   :  { %3049 = vrcp.f32 %v757_v12 }
 0x945   :  { %3051 = vrcp.f32 %v929_v16 }
 0x951   :  { %v3050_v17 = vpop.eup %3049 }
 0x952   :  { %v3052_v22 = vpop.eup %3051  ;;  %v761_v25 = vmul.f32 %v3050_v17, %v3451_v9 }
 0x953   :  { %v933_v28 = vmul.f32 %v3052_v22, %v3485_v35 }
 0x9ab   :  { %v764_v19 = vpop.permute.xlu0 %763 }
 0x9ac   :  { %v766_v21 = vmul.f32 %v3050_v17, %v764_v19 }
 0x9ae   :  { %768 = vrot.lane.b32.xlu0 %v766_v21, %s3231_s16 }
 0x9b3   :  { %v936_v23 = vpop.permute.xlu1 %935 }
 0x9b4   :  { %v938_v24 = vmul.f32 %v3052_v22, %v936_v23 }
 0x9b6   :  { %940 = vrot.lane.b32.xlu1 %v938_v24, %s3231_s16 }
 0xa20   :  { %v769_v26 = vpop.permute.xlu0 %768 }
 0xa21   :  { %v3550_v27 = vadd.f32 %v769_v26, %v761_v25 }
 0xa23   :  { %3053 = vtanh.f32 %v3550_v27 }
 0xa28   :  { %v941_v29 = vpop.permute.xlu1 %940 }
 0xa29   :  { %v3554_v30 = vadd.f32 %v941_v29, %v933_v28 }
 0xa2b   :  { %3055 = vtanh.f32 %v3554_v30 }
 0xa30   :  { %v3054_v31 = vpop.eup %3053 }
 0xa31   :  { %774 = vrot.lane.b32.xlu0 %v3054_v31, %s3230_s15 }
 0xa38   :  { %v3056_v34 = vpop.eup %3055 }
 0xa39   :  { %946 = vrot.lane.b32.xlu1 %v3056_v34, %s3230_s15 }
 0xaa3   :  { %v775_v32 = vpop.permute.xlu0 %774 }
 0xaa4   :  { %v777_v9 = vmul.f32 %v3050_v17, %v775_v32 }
 0xaa6   :  { %779 = vrot.lane.b32.xlu0 %v777_v9, %s3231_s16 }
 0xaab   :  { %v947_v36 = vpop.permute.xlu1 %946 }
 0xaac   :  { %v949_v37 = vmul.f32 %v3052_v22, %v947_v36 }
 0xaae   :  { %951 = vrot.lane.b32.xlu1 %v949_v37, %s3231_s16 }
 0xb18   :  { %v780_v35 = vpop.permute.xlu0 %779 }
 0xb19   :  { %2808 = vmatmul.mubr.msk.f32.vlgmr.msra.gmra.mxu1 %vm238_vm1, %v780_v35 }
 0xb1a   :  { %2822 = vmatpush3.msra.mxu1 %v3405_v47  ;;  %2829 = vmatprep.mubr.msk.f32.mxu1 %vm3229_vm0, %v3228_v1 }
 0xb1b   :  { %2823 = vmatprep.subr.mxu1 %v3228_v1 }
 0xb1c   :  { %2824 = vmatpush3.msra.mxu1 %v3407_v48 }
 0xb1d   :  { %2825 = vmatprep.subr.mxu1 %v3228_v1 }
 0xb1e   :  { %2826 = vmatpush3.msra.mxu1 %v3412_v49 }
 0xb1f   :  { %2827 = vmatprep.subr.mxu1 %v3228_v1 }
 0xb20   :  { %2828 = vmatpush3.msra.mxu1 %v3418_v50  ;;  %v952_v38 = vpop.permute.xlu1 %951 }
 0xb21   :  { %2830 = vmatmul.mubr.msk.f32.vlgmr.msra.gmra.mxu1 %vm238_vm1, %v952_v38  ;;  %2843 = vmatprep.subr.mxu1 %v3228_v1 }
 0xb22   :  { %2844 = vmatpush3.msra.mxu1 %v3333_v13  ;;  %2851 = vmatprep.mubr.msk.f32.mxu1 %vm3229_vm0, %v3228_v1 }
 0xb23   :  { %2845 = vmatprep.subr.mxu1 %v3228_v1 }
 0xb24   :  { %2846 = vmatpush3.msra.mxu1 %v3340_v15 }
 0xb25   :  { %2847 = vmatprep.subr.mxu1 %v3228_v1 }
 0xb26   :  { %2848 = vmatpush3.msra.mxu1 %v3351_v18 }
 0xb27   :  { %2849 = vmatprep.subr.mxu1 %v3228_v1 }
 0xb28   :  { %2850 = vmatpush3.msra.mxu1 %v3357_v20 }
 0xb29   :  { %2852 = vmatmul.mubr.msk.f32.vlgmr.msra.gmra.mxu1 %vm238_vm1, %v952_v38  ;;  %2865 = vmatprep.subr.mxu1 %v3228_v1  ;;  %v193_v38 = vadd.f32 %v3397_v33, %v3536_v53 }
 0xb2a   :  { %2866 = vmatpush3.msra.mxu1 %v3306_v5  ;;  %2873 = vmatprep.mubr.msk.f32.mxu1 %vm3229_vm0, %v3228_v1 }
 0xb2b   :  { %2867 = vmatprep.subr.mxu1 %v3228_v1 }
 0xb2c   :  { %2868 = vmatpush3.msra.mxu1 %v3312_v7 }
 0xb2d   :  { %2869 = vmatprep.subr.mxu1 %v3228_v1 }
 0xb2e   :  { %2870 = vmatpush3.msra.mxu1 %v3315_v8 }
 0xb2f   :  { %2871 = vmatprep.subr.mxu1 %v3228_v1 }
 0xb30   :  { %2872 = vmatpush3.msra.mxu1 %v3322_v10 }
 0xb31   :  { %2887 = vmatprep.subr.mxu1 %v3228_v1 }
 0xbd9   :  { %v849_v39 = vpop.f32.mrf.mxu1 }
 0xbda   :  { %v850_v41 = vadd.f32 %v3445_v55, %v849_v39 }
 0xbdb   :  { %v2809_v40 = vpop.f32.mrf.mxu1 }
 0xbe1   :  { %v1021_v42 = vpop.f32.mrf.mxu1 }
 0xbe2   :  { %v1022_v43 = vadd.f32 %v1021_v42, %v850_v41 }
 0xbe3   :  { %v2831_v44 = vpop.f32.mrf.mxu1 }
 0xbe4   :  { %3057 = vtanh.f32 %v1022_v43  ;;  %v2512_v61 = vmul.f32 -1.442695, %v1022_v43 }
 0xbe9   :  { %v1192_v51 = vpop.f32.mrf.mxu1 }
 0xbea   :  { %v1196_v57 = vadd.f32 %v1192_v51, %v188_v45 }
 0xbeb   :  { %v2853_v58 = vpop.f32.mrf.mxu1 }
 0xbec   :  { %3059 = vtanh.f32 %v1196_v57  ;;  %v2515_v62 = vmul.f32 -1.442695, %v1196_v57 }
 0xbed   :  { %3061 = vpow2.f32 %v2512_v61 }
 0xbee   :  { %3063 = vpow2.f32 %v2515_v62 }
 0xbf1   :  { %v3058_v59 = vpop.eup %3057 }
 0xbf2   :  { %1034 = vrot.lane.b32.xlu0 %v3058_v59, %s3230_s15 }
 0xbf9   :  { %v3060_v60 = vpop.eup %3059 }
 0xbfa   :  { %1206 = vrot.lane.b32.xlu1 %v3060_v60, %s3230_s15  ;;  %v3062_v63 = vpop.eup %3061 }
 0xbfb   :  { %v1028_v0 = vadd.f32 1.0, %v3062_v63  ;;  %v3064_v2 = vpop.eup %3063 }
 0xbfc   :  { %v1200_v3 = vadd.f32 1.0, %v3064_v2 }
 0xbfd   :  { %3065 = vrcp.f32 %v1028_v0 }
 0xbfe   :  { %3067 = vrcp.f32 %v1200_v3 }
 0xc0a   :  { %v3066_v46 = vpop.eup %3065 }
 0xc0b   :  { %v3068_v11 = vpop.eup %3067  ;;  %v1032_v16 = vmul.f32 %v3066_v46, %v3550_v27 }
 0xc0c   :  { %v1204_v21 = vmul.f32 %v3068_v11, %v3554_v30 }
 0xc64   :  { %v1035_v4 = vpop.permute.xlu0 %1034 }
 0xc65   :  { %v1037_v6 = vmul.f32 %v3066_v46, %v1035_v4 }
 0xc67   :  { %1039 = vrot.lane.b32.xlu0 %v1037_v6, %s3231_s16 }
 0xc6c   :  { %v1207_v12 = vpop.permute.xlu1 %1206 }
 0xc6d   :  { %v1209_v14 = vmul.f32 %v3068_v11, %v1207_v12 }
 0xc6f   :  { %1211 = vrot.lane.b32.xlu1 %v1209_v14, %s3231_s16 }
 0xcd9   :  { %v1040_v17 = vpop.permute.xlu0 %1039 }
 0xcda   :  { %v3602_v19 = vadd.f32 %v1040_v17, %v1032_v16 }
 0xcdc   :  { %3069 = vtanh.f32 %v3602_v19 }
 0xce1   :  { %v1212_v22 = vpop.permute.xlu1 %1211 }
 0xce2   :  { %v3606_v23 = vadd.f32 %v1212_v22, %v1204_v21 }
 0xce4   :  { %3071 = vtanh.f32 %v3606_v23 }
 0xce9   :  { %v3070_v24 = vpop.eup %3069 }
 0xcea   :  { %1045 = vrot.lane.b32.xlu0 %v3070_v24, %s3230_s15 }
 0xcf1   :  { %v3072_v25 = vpop.eup %3071 }
 0xcf2   :  { %1217 = vrot.lane.b32.xlu1 %v3072_v25, %s3230_s15 }
 0xd5c   :  { %v1046_v26 = vpop.permute.xlu0 %1045 }
 0xd5d   :  { %v1048_v27 = vmul.f32 %v3066_v46, %v1046_v26 }
 0xd5f   :  { %1050 = vrot.lane.b32.xlu0 %v1048_v27, %s3231_s16 }
 0xd64   :  { %v1218_v28 = vpop.permute.xlu1 %1217 }
 0xd65   :  { %v1220_v29 = vmul.f32 %v3068_v11, %v1218_v28 }
 0xd67   :  { %1222 = vrot.lane.b32.xlu1 %v1220_v29, %s3231_s16 }
 0xdd1   :  { %v1051_v30 = vpop.permute.xlu0 %1050 }
 0xdd2   :  { %2841 = vmatmul.mubr.msk.f32.vlgmr.msra.gmra.mxu0 %vm238_vm1, %v1051_v30 }
 0xdd3   :  { %2855 = vmatpush3.msra.mxu0 %v3405_v47  ;;  %2862 = vmatprep.mubr.msk.f32.mxu0 %vm3229_vm0, %v3228_v1 }
 0xdd4   :  { %2856 = vmatprep.subr.mxu0 %v3228_v1 }
 0xdd5   :  { %2857 = vmatpush3.msra.mxu0 %v3407_v48 }
 0xdd6   :  { %2858 = vmatprep.subr.mxu0 %v3228_v1 }
 0xdd7   :  { %2859 = vmatpush3.msra.mxu0 %v3412_v49 }
 0xdd8   :  { %2860 = vmatprep.subr.mxu0 %v3228_v1 }
 0xdd9   :  { %2861 = vmatpush3.msra.mxu0 %v3418_v50  ;;  %v1223_v31 = vpop.permute.xlu1 %1222 }
 0xdda   :  { %2876 = vmatprep.subr.mxu0 %v3228_v1  ;;  %2863 = vmatmul.mubr.msk.f32.vlgmr.msra.gmra.mxu0 %vm238_vm1, %v1223_v31 }
 0xddb   :  { %2877 = vmatpush3.msra.mxu0 %v3333_v13  ;;  %2884 = vmatprep.mubr.msk.f32.mxu0 %vm3229_vm0, %v3228_v1 }
 0xddc   :  { %2878 = vmatprep.subr.mxu0 %v3228_v1 }
 0xddd   :  { %2879 = vmatpush3.msra.mxu0 %v3340_v15 }
 0xdde   :  { %2880 = vmatprep.subr.mxu0 %v3228_v1 }
 0xddf   :  { %2881 = vmatpush3.msra.mxu0 %v3351_v18 }
 0xde0   :  { %2882 = vmatprep.subr.mxu0 %v3228_v1 }
 0xde1   :  { %2883 = vmatpush3.msra.mxu0 %v3357_v20 }
 0xde2   :  { %2885 = vmatmul.mubr.msk.f32.vlgmr.msra.gmra.mxu0 %vm238_vm1, %v1223_v31  ;;  %2898 = vmatprep.subr.mxu0 %v3228_v1 }
 0xde3   :  { %2899 = vmatpush3.msra.mxu0 %v3306_v5  ;;  %2906 = vmatprep.mubr.msk.f32.mxu0 %vm3229_vm0, %v3228_v1 }
 0xde4   :  { %2900 = vmatprep.subr.mxu0 %v3228_v1 }
 0xde5   :  { %2901 = vmatpush3.msra.mxu0 %v3312_v7 }
 0xde6   :  { %2902 = vmatprep.subr.mxu0 %v3228_v1 }
 0xde7   :  { %2903 = vmatpush3.msra.mxu0 %v3315_v8 }
 0xde8   :  { %2904 = vmatprep.subr.mxu0 %v3228_v1 }
 0xde9   :  { %2905 = vmatpush3.msra.mxu0 %v3322_v10 }
 0xdea   :  { %2920 = vmatprep.subr.mxu0 %v3228_v1 }
 0xe92   :  { %v1120_v34 = vpop.f32.mrf.mxu0 }
 0xe93   :  { %v1121_v9 = vadd.f32 %v3445_v55, %v1120_v34 }
 0xe94   :  { %v2842_v32 = vpop.f32.mrf.mxu0 }
 0xe9a   :  { %v1292_v36 = vpop.f32.mrf.mxu0 }
 0xe9b   :  { %v1293_v37 = vadd.f32 %v1292_v36, %v1121_v9 }
 0xe9c   :  { %v2864_v35 = vpop.f32.mrf.mxu0 }
 0xe9d   :  { %3073 = vtanh.f32 %v1293_v37  ;;  %v2517_v44 = vmul.f32 -1.442695, %v1293_v37 }
 0xea2   :  { %v1463_v39 = vpop.f32.mrf.mxu0 }
 0xea3   :  { %v1467_v40 = vadd.f32 %v1463_v39, %v193_v38 }
 0xea4   :  { %v2886_v41 = vpop.f32.mrf.mxu0 }
 0xea5   :  { %3075 = vtanh.f32 %v1467_v40  ;;  %v2520_v45 = vmul.f32 -1.442695, %v1467_v40 }
 0xea6   :  { %3077 = vpow2.f32 %v2517_v44 }
 0xea7   :  { %3079 = vpow2.f32 %v2520_v45 }
 0xeaa   :  { %v3074_v42 = vpop.eup %3073 }
 0xeab   :  { %1305 = vrot.lane.b32.xlu0 %v3074_v42, %s3230_s15 }
 0xeb2   :  { %v3076_v43 = vpop.eup %3075 }
 0xeb3   :  { %1477 = vrot.lane.b32.xlu1 %v3076_v43, %s3230_s15  ;;  %v3078_v51 = vpop.eup %3077 }
 0xeb4   :  { %v1299_v57 = vadd.f32 1.0, %v3078_v51  ;;  %v3080_v58 = vpop.eup %3079 }
 0xeb5   :  { %v1471_v59 = vadd.f32 1.0, %v3080_v58 }
 0xeb6   :  { %3081 = vrcp.f32 %v1299_v57 }
 0xeb7   :  { %3083 = vrcp.f32 %v1471_v59 }
 0xec3   :  { %v3082_v53 = vpop.eup %3081 }
 0xec4   :  { %v3084_v62 = vpop.eup %3083  ;;  %v1303_v2 = vmul.f32 %v3082_v53, %v3602_v19 }
 0xec5   :  { %v1475_v4 = vmul.f32 %v3084_v62, %v3606_v23 }
 0xf1d   :  { %v1306_v60 = vpop.permute.xlu0 %1305 }
 0xf1e   :  { %v1308_v61 = vmul.f32 %v3082_v53, %v1306_v60 }
 0xf20   :  { %1310 = vrot.lane.b32.xlu0 %v1308_v61, %s3231_s16  ;;  %v3149_v61 = vld [vmem:[#allocation8 + $0x18] sm:$0xff] }
 0xf25   :  { %v1478_v63 = vpop.permute.xlu1 %1477 }
 0xf26   :  { %v1480_v0 = vmul.f32 %v3084_v62, %v1478_v63  ;;  %v3151_v63 = vld [vmem:[#allocation8 + $0x8] sm:$0xff] }
 0xf28   :  { %1482 = vrot.lane.b32.xlu1 %v1480_v0, %s3231_s16  ;;  %v3152_v0 = vld [vmem:[#allocation8] sm:$0xff] }
 0xf92   :  { %v1311_v3 = vpop.permute.xlu0 %1310 }
 0xf93   :  { %v3654_v46 = vadd.f32 %v1311_v3, %v1303_v2 }
 0xf95   :  { %3085 = vtanh.f32 %v3654_v46 }
 0xf9a   :  { %v1483_v6 = vpop.permute.xlu1 %1482 }
 0xf9b   :  { %v3658_v11 = vadd.f32 %v1483_v6, %v1475_v4 }
 0xf9d   :  { %3087 = vtanh.f32 %v3658_v11 }
 0xfa2   :  { %v3086_v12 = vpop.eup %3085 }
 0xfa3   :  { %1316 = vrot.lane.b32.xlu0 %v3086_v12, %s3230_s15  ;;  %v3758_v12 = vld [vmem:[%s3867_s3] ss:$0 sm:$0xff] }
 0xfaa   :  { %v3088_v14 = vpop.eup %3087 }
 0xfab   :  { %1488 = vrot.lane.b32.xlu1 %v3088_v14, %s3230_s15  ;;  %v203_v14 = vadd.f32 %v3758_v12, %v3540_v56 }
0x1015   :  { %v1317_v16 = vpop.permute.xlu0 %1316 }
0x1016   :  { %v1319_v17 = vmul.f32 %v3082_v53, %v1317_v16 }
0x1018   :  { %1321 = vrot.lane.b32.xlu0 %v1319_v17, %s3231_s16 }
0x101d   :  { %v1489_v19 = vpop.permute.xlu1 %1488 }
0x101e   :  { %v1491_v21 = vmul.f32 %v3084_v62, %v1489_v19  ;;  %v3150_v62 = vld [vmem:[#allocation8 + $0x10] sm:$0xff] }
0x1020   :  { %1493 = vrot.lane.b32.xlu1 %v1491_v21, %s3231_s16 }
0x108a   :  { %v1322_v22 = vpop.permute.xlu0 %1321 }
0x108b   :  { %2874 = vmatmul.mubr.msk.f32.vlgmr.msra.gmra.mxu1 %vm238_vm1, %v1322_v22 }
0x108c   :  { %2888 = vmatpush3.msra.mxu1 %v3405_v47  ;;  %2895 = vmatprep.mubr.msk.f32.mxu1 %vm3229_vm0, %v3228_v1 }
0x108d   :  { %2889 = vmatprep.subr.mxu1 %v3228_v1 }
0x108e   :  { %2890 = vmatpush3.msra.mxu1 %v3407_v48 }
0x108f   :  { %2891 = vmatprep.subr.mxu1 %v3228_v1 }
0x1090   :  { %2892 = vmatpush3.msra.mxu1 %v3412_v49 }
0x1091   :  { %2893 = vmatprep.subr.mxu1 %v3228_v1 }
0x1092   :  { %2894 = vmatpush3.msra.mxu1 %v3418_v50  ;;  %v1494_v23 = vpop.permute.xlu1 %1493 }
0x1093   :  { %2896 = vmatmul.mubr.msk.f32.vlgmr.msra.gmra.mxu1 %vm238_vm1, %v1494_v23  ;;  %2909 = vmatprep.subr.mxu1 %v3228_v1 }
0x1094   :  { %2910 = vmatpush3.msra.mxu1 %v3333_v13  ;;  %2917 = vmatprep.mubr.msk.f32.mxu1 %vm3229_vm0, %v3228_v1 }
0x1095   :  { %2911 = vmatprep.subr.mxu1 %v3228_v1 }
0x1096   :  { %2912 = vmatpush3.msra.mxu1 %v3340_v15 }
0x1097   :  { %2913 = vmatprep.subr.mxu1 %v3228_v1 }
0x1098   :  { %2914 = vmatpush3.msra.mxu1 %v3351_v18 }
0x1099   :  { %2915 = vmatprep.subr.mxu1 %v3228_v1 }
0x109a   :  { %2916 = vmatpush3.msra.mxu1 %v3357_v20 }
0x109b   :  { %2918 = vmatmul.mubr.msk.f32.vlgmr.msra.gmra.mxu1 %vm238_vm1, %v1494_v23  ;;  %2931 = vmatprep.subr.mxu1 %v3228_v1 }
0x109c   :  { %2932 = vmatpush3.msra.mxu1 %v3306_v5  ;;  %2939 = vmatprep.mubr.msk.f32.mxu1 %vm3229_vm0, %v3228_v1 }
0x109d   :  { %2933 = vmatprep.subr.mxu1 %v3228_v1 }
0x109e   :  { %2934 = vmatpush3.msra.mxu1 %v3312_v7  ;;  %v198_v7 = vadd.f32 %v3534_v52, %v3397_v33 }
0x109f   :  { %2935 = vmatprep.subr.mxu1 %v3228_v1 }
0x10a0   :  { %2936 = vmatpush3.msra.mxu1 %v3315_v8 }
0x10a1   :  { %2937 = vmatprep.subr.mxu1 %v3228_v1 }
0x10a2   :  { %2938 = vmatpush3.msra.mxu1 %v3322_v10 }
0x10a3   :  { %2953 = vmatprep.subr.mxu1 %v3228_v1 }
0x114b   :  { %v1391_v13 = vpop.f32.mrf.mxu1 }
0x114c   :  { %v1392_v5 = vadd.f32 %v3445_v55, %v1391_v13 }
0x114d   :  { %v2875_v15 = vpop.f32.mrf.mxu1 }
0x1153   :  { %v1563_v18 = vpop.f32.mrf.mxu1 }
0x1154   :  { %v1564_v20 = vadd.f32 %v1563_v18, %v1392_v5 }
0x1155   :  { %v2897_v24 = vpop.f32.mrf.mxu1 }
0x1156   :  { %3089 = vtanh.f32 %v1564_v20  ;;  %v2522_v28 = vmul.f32 -1.442695, %v1564_v20 }
0x115b   :  { %v1734_v25 = vpop.f32.mrf.mxu1 }
0x115c   :  { %v1738_v26 = vadd.f32 %v1734_v25, %v198_v7 }
0x115d   :  { %v2919_v8 = vpop.f32.mrf.mxu1 }
0x115e   :  { %3091 = vtanh.f32 %v1738_v26  ;;  %v2525_v29 = vmul.f32 -1.442695, %v1738_v26 }
0x115f   :  { %3093 = vpow2.f32 %v2522_v28 }
0x1160   :  { %3095 = vpow2.f32 %v2525_v29 }
0x1163   :  { %v3090_v27 = vpop.eup %3089 }
0x1164   :  { %1576 = vrot.lane.b32.xlu0 %v3090_v27, %s3230_s15 }
0x116b   :  { %v3092_v10 = vpop.eup %3091 }
0x116c   :  { %1748 = vrot.lane.b32.xlu1 %v3092_v10, %s3230_s15  ;;  %v3094_v30 = vpop.eup %3093 }
0x116d   :  { %v1570_v31 = vadd.f32 1.0, %v3094_v30  ;;  %v3096_v34 = vpop.eup %3095 }
0x116e   :  { %v1742_v32 = vadd.f32 1.0, %v3096_v34 }
0x116f   :  { %3097 = vrcp.f32 %v1570_v31 }
0x1170   :  { %3099 = vrcp.f32 %v1742_v32 }
0x117c   :  { %v3098_v33 = vpop.eup %3097 }
0x117d   :  { %v3100_v36 = vpop.eup %3099  ;;  %v1574_v38 = vmul.f32 %v3098_v33, %v3654_v46 }
0x117e   :  { %v1746_v41 = vmul.f32 %v3100_v36, %v3658_v11 }
0x11d6   :  { %v1577_v52 = vpop.permute.xlu0 %1576 }
0x11d7   :  { %v1579_v9 = vmul.f32 %v3098_v33, %v1577_v52 }
0x11d9   :  { %1581 = vrot.lane.b32.xlu0 %v1579_v9, %s3231_s16 }
0x11de   :  { %v1749_v37 = vpop.permute.xlu1 %1748 }
0x11df   :  { %v1751_v35 = vmul.f32 %v3100_v36, %v1749_v37  ;;  %v3779_v37 = vld [vmem:[#allocation6 + $0x18] sm:$0xff] }
0x11e1   :  { %1753 = vrot.lane.b32.xlu1 %v1751_v35, %s3231_s16  ;;  %v3785_v35 = vld [vmem:[#allocation6 + $0x10] sm:$0xff] }
0x124b   :  { %v1582_v39 = vpop.permute.xlu0 %1581 }
0x124c   :  { %v3706_v40 = vadd.f32 %v1582_v39, %v1574_v38  ;;  %v3789_v38 = vld [vmem:[#allocation6 + $0x8] sm:$0xff]  ;;  %v3793_v39 = vld [vmem:[#allocation6] sm:$0xff] }
0x124e   :  { %3101 = vtanh.f32 %v3706_v40 }
0x1253   :  { %v1754_v42 = vpop.permute.xlu1 %1753 }
0x1254   :  { %v3710_v43 = vadd.f32 %v1754_v42, %v1746_v41 }
0x1256   :  { %3103 = vtanh.f32 %v3710_v43 }
0x125b   :  { %v3102_v44 = vpop.eup %3101 }
0x125c   :  { %1587 = vrot.lane.b32.xlu0 %v3102_v44, %s3230_s15 }
0x1263   :  { %v3104_v45 = vpop.eup %3103 }
0x1264   :  { %1759 = vrot.lane.b32.xlu1 %v3104_v45, %s3230_s15 }
0x12ce   :  { %v1588_v51 = vpop.permute.xlu0 %1587 }
0x12cf   :  { %v1590_v57 = vmul.f32 %v3098_v33, %v1588_v51 }
0x12d1   :  { %1592 = vrot.lane.b32.xlu0 %v1590_v57, %s3231_s16 }
0x12d6   :  { %v1760_v58 = vpop.permute.xlu1 %1759 }
0x12d7   :  { %v1762_v59 = vmul.f32 %v3100_v36, %v1760_v58  ;;  %v208_v58 = vadd.f32 %v3758_v12, %v3538_v54 }
0x12d9   :  { %1764 = vrot.lane.b32.xlu1 %v1762_v59, %s3231_s16 }
0x1343   :  { %v1593_v53 = vpop.permute.xlu0 %1592 }
0x1344   :  { %2907 = vmatmul.mubr.msk.f32.vlgmr.msra.gmra.mxu0 %vm238_vm1, %v1593_v53 }
0x1345   :  { %2921 = vmatpush3.msra.mxu0 %v3405_v47  ;;  %2928 = vmatprep.mubr.msk.f32.mxu0 %vm3229_vm0, %v3228_v1  ;;  %v3729_v47 = vld [vmem:[#allocation4 + $0x18] sm:$0xff] }
0x1346   :  { %2922 = vmatprep.subr.mxu0 %v3228_v1 }
0x1347   :  { %2923 = vmatpush3.msra.mxu0 %v3407_v48  ;;  %v3735_v48 = vld [vmem:[#allocation4 + $0x10] sm:$0xff] }
0x1348   :  { %2924 = vmatprep.subr.mxu0 %v3228_v1 }
0x1349   :  { %2925 = vmatpush3.msra.mxu0 %v3412_v49  ;;  %v3739_v49 = vld [vmem:[#allocation4 + $0x8] sm:$0xff] }
0x134a   :  { %2926 = vmatprep.subr.mxu0 %v3228_v1 }
0x134b   :  { %2927 = vmatpush3.msra.mxu0 %v3418_v50  ;;  %v1765_v60 = vpop.permute.xlu1 %1764  ;;  %v3743_v50 = vld [vmem:[#allocation4] sm:$0xff] }
0x134c   :  { %2942 = vmatprep.subr.mxu0 %v3228_v1  ;;  %2929 = vmatmul.mubr.msk.f32.vlgmr.msra.gmra.mxu0 %vm238_vm1, %v1765_v60 }
0x134d   :  { %2943 = vmatpush3.msra.mxu0 %v3729_v47  ;;  %2950 = vmatprep.mubr.msk.f32.mxu0 %vm3229_vm0, %v3228_v1 }
0x134e   :  { %2944 = vmatprep.subr.mxu0 %v3228_v1 }
0x134f   :  { %2945 = vmatpush3.msra.mxu0 %v3735_v48 }
0x1350   :  { %2946 = vmatprep.subr.mxu0 %v3228_v1 }
0x1351   :  { %2947 = vmatpush3.msra.mxu0 %v3739_v49 }
0x1352   :  { %2948 = vmatprep.subr.mxu0 %v3228_v1 }
0x1353   :  { %2949 = vmatpush3.msra.mxu0 %v3743_v50 }
0x1354   :  { %2951 = vmatmul.mubr.msk.f32.vlgmr.msra.gmra.mxu0 %vm238_vm1, %v1765_v60  ;;  %2964 = vmatprep.subr.mxu0 %v3228_v1 }
0x1355   :  { %2965 = vmatpush3.msra.mxu0 %v3149_v61  ;;  %2972 = vmatprep.mubr.msk.f32.mxu0 %vm3229_vm0, %v3228_v1 }
0x1356   :  { %2966 = vmatprep.subr.mxu0 %v3228_v1 }
0x1357   :  { %2967 = vmatpush3.msra.mxu0 %v3150_v62 }
0x1358   :  { %2968 = vmatprep.subr.mxu0 %v3228_v1 }
0x1359   :  { %2969 = vmatpush3.msra.mxu0 %v3151_v63 }
0x135a   :  { %2970 = vmatprep.subr.mxu0 %v3228_v1 }
0x135b   :  { %2971 = vmatpush3.msra.mxu0 %v3152_v0 }
0x135c   :  { %2986 = vmatprep.subr.mxu0 %v3228_v1 }
0x1404   :  { %v1662_v2 = vpop.f32.mrf.mxu0 }
0x1405   :  { %v1663_v46 = vadd.f32 %v3445_v55, %v1662_v2 }
0x1406   :  { %v2908_v3 = vpop.f32.mrf.mxu0 }
0x140c   :  { %v1834_v4 = vpop.f32.mrf.mxu0 }
0x140d   :  { %v1835_v6 = vadd.f32 %v1834_v4, %v1663_v46 }
0x140e   :  { %v2930_v11 = vpop.f32.mrf.mxu0 }
0x140f   :  { %3105 = vtanh.f32 %v1835_v6  ;;  %v2527_v22 = vmul.f32 -1.442695, %v1835_v6 }
0x1414   :  { %v2005_v16 = vpop.f32.mrf.mxu0 }
0x1415   :  { %v2009_v17 = vadd.f32 %v2005_v16, %v203_v14 }
0x1416   :  { %v2952_v19 = vpop.f32.mrf.mxu0 }
0x1417   :  { %3107 = vtanh.f32 %v2009_v17  ;;  %v2530_v23 = vmul.f32 -1.442695, %v2009_v17 }
0x1418   :  { %3109 = vpow2.f32 %v2527_v22 }
0x1419   :  { %3111 = vpow2.f32 %v2530_v23 }
0x141c   :  { %v3106_v21 = vpop.eup %3105 }
0x141d   :  { %1847 = vrot.lane.b32.xlu0 %v3106_v21, %s3230_s15 }
0x1424   :  { %v3108_v55 = vpop.eup %3107 }
0x1425   :  { %2019 = vrot.lane.b32.xlu1 %v3108_v55, %s3230_s15  ;;  %v3110_v13 = vpop.eup %3109 }
0x1426   :  { %v1841_v15 = vadd.f32 1.0, %v3110_v13  ;;  %v3112_v5 = vpop.eup %3111 }
0x1427   :  { %v2013_v18 = vadd.f32 1.0, %v3112_v5 }
0x1428   :  { %3113 = vrcp.f32 %v1841_v15 }
0x1429   :  { %3115 = vrcp.f32 %v2013_v18 }
0x1435   :  { %v3114_v56 = vpop.eup %3113 }
0x1436   :  { %v3116_v7 = vpop.eup %3115  ;;  %v1845_v8 = vmul.f32 %v3114_v56, %v3706_v40 }
0x1437   :  { %v2017_v28 = vmul.f32 %v3116_v7, %v3710_v43  ;;  %v3814_v43 = vld [vmem:[%s3870_s6] ss:$0 sm:$0xff] }
0x148f   :  { %v1848_v20 = vpop.permute.xlu0 %1847 }
0x1490   :  { %v1850_v24 = vmul.f32 %v3114_v56, %v1848_v20 }
0x1492   :  { %1852 = vrot.lane.b32.xlu0 %v1850_v24, %s3231_s16 }
0x1497   :  { %v2020_v25 = vpop.permute.xlu1 %2019 }
0x1498   :  { %v2022_v26 = vmul.f32 %v3116_v7, %v2020_v25 }
0x149a   :  { %2024 = vrot.lane.b32.xlu1 %v2022_v26, %s3231_s16 }
0x1504   :  { %v1853_v27 = vpop.permute.xlu0 %1852 }
0x1505   :  { %v3767_v10 = vadd.f32 %v1853_v27, %v1845_v8 }
0x1507   :  { %3117 = vtanh.f32 %v3767_v10 }
0x150c   :  { %v2025_v29 = vpop.permute.xlu1 %2024 }
0x150d   :  { %v3771_v30 = vadd.f32 %v2025_v29, %v2017_v28 }
0x150f   :  { %3119 = vtanh.f32 %v3771_v30 }
0x1514   :  { %v3118_v31 = vpop.eup %3117 }
0x1515   :  { %1858 = vrot.lane.b32.xlu0 %v3118_v31, %s3230_s15 }
0x151c   :  { %v3120_v34 = vpop.eup %3119 }
0x151d   :  { %2030 = vrot.lane.b32.xlu1 %v3120_v34, %s3230_s15 }
0x1587   :  { %v1859_v32 = vpop.permute.xlu0 %1858 }
0x1588   :  { %v1861_v33 = vmul.f32 %v3114_v56, %v1859_v32 }
0x158a   :  { %1863 = vrot.lane.b32.xlu0 %v1861_v33, %s3231_s16 }
0x158f   :  { %v2031_v52 = vpop.permute.xlu1 %2030 }
0x1590   :  { %v2033_v9 = vmul.f32 %v3116_v7, %v2031_v52  ;;  %v2407_v52 = vld [vmem:[%s3871_s7 + $0x18] sm:$0xff] }
0x1592   :  { %2035 = vrot.lane.b32.xlu1 %v2033_v9, %s3231_s16  ;;  %v2406_v9 = vld [vmem:[%s3871_s7 + $0x10] sm:$0xff] }
0x15fc   :  { %v1864_v36 = vpop.permute.xlu0 %1863 }
0x15fd   :  { %2940 = vmatmul.mubr.msk.f32.vlgmr.msra.gmra.mxu1 %vm238_vm1, %v1864_v36  ;;  %v2405_v36 = vld [vmem:[%s3871_s7 + $0x8] sm:$0xff] }
0x15fe   :  { %2954 = vmatpush3.msra.mxu1 %v3779_v37  ;;  %2961 = vmatprep.mubr.msk.f32.mxu1 %vm3229_vm0, %v3228_v1 }
0x15ff   :  { %2955 = vmatprep.subr.mxu1 %v3228_v1 }
0x1600   :  { %2956 = vmatpush3.msra.mxu1 %v3785_v35 }
0x1601   :  { %2957 = vmatprep.subr.mxu1 %v3228_v1 }
0x1602   :  { %2958 = vmatpush3.msra.mxu1 %v3789_v38 }
0x1603   :  { %2959 = vmatprep.subr.mxu1 %v3228_v1 }
0x1604   :  { %2960 = vmatpush3.msra.mxu1 %v3793_v39  ;;  %v2036_v40 = vpop.permute.xlu1 %2035 }
0x1605   :  { %2962 = vmatmul.mubr.msk.f32.vlgmr.msra.gmra.mxu1 %vm238_vm1, %v2036_v40  ;;  %2975 = vmatprep.subr.mxu1 %v3228_v1 }
0x1606   :  { %2976 = vmatpush3.msra.mxu1 %v3729_v47  ;;  %2983 = vmatprep.mubr.msk.f32.mxu1 %vm3229_vm0, %v3228_v1 }
0x1607   :  { %2977 = vmatprep.subr.mxu1 %v3228_v1 }
0x1608   :  { %2978 = vmatpush3.msra.mxu1 %v3735_v48 }
0x1609   :  { %2979 = vmatprep.subr.mxu1 %v3228_v1 }
0x160a   :  { %2980 = vmatpush3.msra.mxu1 %v3739_v49 }
0x160b   :  { %2981 = vmatprep.subr.mxu1 %v3228_v1 }
0x160c   :  { %2982 = vmatpush3.msra.mxu1 %v3743_v50 }
0x160d   :  { %2984 = vmatmul.mubr.msk.f32.vlgmr.msra.gmra.mxu1 %vm238_vm1, %v2036_v40  ;;  %2997 = vmatprep.subr.mxu1 %v3228_v1 }
0x160e   :  { %3005 = vmatprep.mubr.msk.f32.mxu1 %vm3229_vm0, %v3228_v1  ;;  %2998 = vmatpush3.msra.mxu1 %v2407_v52 }
0x160f   :  { %2999 = vmatprep.subr.mxu1 %v3228_v1 }
0x1610   :  { %3000 = vmatpush3.msra.mxu1 %v2406_v9 }
0x1611   :  { %3001 = vmatprep.subr.mxu1 %v3228_v1 }
0x1612   :  { %3002 = vmatpush3.msra.mxu1 %v2405_v36 }
0x1613   :  { %3003 = vmatprep.subr.mxu1 %v3228_v1 }
0x16bd   :  { %v1933_v41 = vpop.f32.mrf.mxu1 }
0x16be   :  { %v1934_v44 = vadd.f32 %v3814_v43, %v1933_v41  ;;  %v2538_v41 = vld [vmem:[#allocation3] ss:$0 sm:$0xff] }
0x16bf   :  { %v2941_v42 = vpop.f32.mrf.mxu1 }
0x16c5   :  { %v2105_v45 = vpop.f32.mrf.mxu1 }
0x16c6   :  { %v2106_v51 = vadd.f32 %v2105_v45, %v1934_v44 }
0x16c7   :  { %v2963_v57 = vpop.f32.mrf.mxu1 }
0x16c8   :  { %3121 = vtanh.f32 %v2106_v51  ;;  %v2532_v49 = vmul.f32 -1.442695, %v2106_v51 }
0x16cd   :  { %v2276_v59 = vpop.f32.mrf.mxu1 }
0x16ce   :  { %v2280_v53 = vadd.f32 %v2276_v59, %v208_v58 }
0x16cf   :  { %v2985_v60 = vpop.f32.mrf.mxu1 }
0x16d0   :  { %3123 = vtanh.f32 %v2280_v53  ;;  %v2535_v50 = vmul.f32 -1.442695, %v2280_v53 }
0x16d1   :  { %3125 = vpow2.f32 %v2532_v49 }
0x16d2   :  { %3127 = vpow2.f32 %v2535_v50 }
0x16d5   :  { %v3122_v47 = vpop.eup %3121 }
0x16d6   :  { %2118 = vrot.lane.b32.xlu0 %v3122_v47, %s3230_s15 }
0x16dd   :  { %v3124_v48 = vpop.eup %3123 }
0x16de   :  { %2290 = vrot.lane.b32.xlu1 %v3124_v48, %s3230_s15  ;;  %v3126_v61 = vpop.eup %3125 }
0x16df   :  { %v2112_v62 = vadd.f32 1.0, %v3126_v61  ;;  %v3128_v63 = vpop.eup %3127 }
0x16e0   :  { %v2284_v0 = vadd.f32 1.0, %v3128_v63 }
0x16e1   :  { %3129 = vrcp.f32 %v2112_v62 }
0x16e2   :  { %3131 = vrcp.f32 %v2284_v0 }
0x16ee   :  { %v3130_v54 = vpop.eup %3129 }
0x16ef   :  { %v3132_v46 = vpop.eup %3131  ;;  %v2116_v11 = vmul.f32 %v3130_v54, %v3767_v10 }
0x16f0   :  { %v2288_v16 = vmul.f32 %v3132_v46, %v3771_v30 }
0x1748   :  { %v2119_v2 = vpop.permute.xlu0 %2118 }
0x1749   :  { %v2121_v3 = vmul.f32 %v3130_v54, %v2119_v2 }
0x174b   :  { %2123 = vrot.lane.b32.xlu0 %v2121_v3, %s3231_s16 }
0x1750   :  { %v2291_v4 = vpop.permute.xlu1 %2290 }
0x1751   :  { %v2293_v6 = vmul.f32 %v3132_v46, %v2291_v4 }
0x1753   :  { %2295 = vrot.lane.b32.xlu1 %v2293_v6, %s3231_s16 }
0x17bd   :  { %v2124_v12 = vpop.permute.xlu0 %2123 }
0x17be   :  { %v2126_v14 = vadd.f32 %v2124_v12, %v2116_v11 }
0x17c0   :  { %3133 = vtanh.f32 %v2126_v14 }
0x17c5   :  { %v2296_v17 = vpop.permute.xlu1 %2295 }
0x17c6   :  { %v2298_v19 = vadd.f32 %v2296_v17, %v2288_v16 }
0x17c8   :  { %3135 = vtanh.f32 %v2298_v19 }
0x17cd   :  { %v3134_v21 = vpop.eup %3133 }
0x17ce   :  { %2129 = vrot.lane.b32.xlu0 %v3134_v21, %s3230_s15 }
0x17d5   :  { %v3136_v55 = vpop.eup %3135 }
0x17d6   :  { %2301 = vrot.lane.b32.xlu1 %v3136_v55, %s3230_s15 }
0x1840   :  { %v2130_v22 = vpop.permute.xlu0 %2129 }
0x1841   :  { %v2132_v23 = vmul.f32 %v3130_v54, %v2130_v22 }
0x1843   :  { %2134 = vrot.lane.b32.xlu0 %v2132_v23, %s3231_s16 }
0x1848   :  { %v2302_v13 = vpop.permute.xlu1 %2301 }
0x1849   :  { %v2304_v15 = vmul.f32 %v3132_v46, %v2302_v13 }
0x184b   :  { %2306 = vrot.lane.b32.xlu1 %v2304_v15, %s3231_s16 }
0x18b5   :  { %v2135_v5 = vpop.permute.xlu0 %2134 }
0x18b6   :  { %2973 = vmatmul.mubr.msk.f32.vlgmr.msra.gmra.mxu0 %vm238_vm1, %v2135_v5 }
0x18b7   :  { %2987 = vmatpush3.msra.mxu0 %v3779_v37  ;;  %2994 = vmatprep.mubr.msk.f32.mxu0 %vm3229_vm0, %v3228_v1  ;;  %v2404_v37 = vld [vmem:[%s3871_s7] sm:$0xff] }
0x18b8   :  { %2988 = vmatprep.subr.mxu0 %v3228_v1  ;;  %3004 = vmatpush3.msra.mxu1 %v2404_v37 }
0x18b9   :  { %2989 = vmatpush3.msra.mxu0 %v3785_v35 }
0x18ba   :  { %2990 = vmatprep.subr.mxu0 %v3228_v1 }
0x18bb   :  { %2991 = vmatpush3.msra.mxu0 %v3789_v38 }
0x18bc   :  { %2992 = vmatprep.subr.mxu0 %v3228_v1 }
0x18bd   :  { %2993 = vmatpush3.msra.mxu0 %v3793_v39  ;;  %v2307_v18 = vpop.permute.xlu1 %2306 }
0x18be   :  { %2995 = vmatmul.mubr.msk.f32.vlgmr.msra.gmra.mxu0 %vm238_vm1, %v2307_v18 }
0x1976   :  { %v2204_v56 = vpop.f32.mrf.mxu0 }
0x1977   :  { %v2205_v24 = vadd.f32 %v3814_v43, %v2204_v56 }
0x1978   :  { %v2974_v20 = vpop.f32.mrf.mxu0 }
0x197e   :  { %v2376_v7 = vpop.f32.mrf.mxu0 }
0x197f   :  { %v2377_v25 = vadd.f32 %v2376_v7, %v2205_v24 }
0x1980   :  { %v2996_v26 = vpop.f32.mrf.mxu0 }
0x1981   :  { %3137 = vtanh.f32 %v2377_v25  ;;  %v2537_v27 = vmul.f32 -1.442695, %v2377_v25 }
0x1983   :  { %3139 = vpow2.f32 %v2537_v27 }
0x198e   :  { %v3138_v8 = vpop.eup %3137 }
0x198f   :  { %2389 = vrot.lane.b32.xlu0 %v3138_v8, %s3230_s15 }
0x1990   :  { %v3140_v10 = vpop.eup %3139 }
0x1991   :  { %v2383_v28 = vadd.f32 1.0, %v3140_v10 }
0x1993   :  { %3141 = vrcp.f32 %v2383_v28 }
0x19a0   :  { %v3142_v29 = vpop.eup %3141 }
0x19a1   :  { %v2387_v34 = vmul.f32 %v3142_v29, %v2126_v14 }
0x1a01   :  { %v2390_v30 = vpop.permute.xlu0 %2389 }
0x1a02   :  { %v2392_v31 = vmul.f32 %v3142_v29, %v2390_v30 }
0x1a04   :  { %2394 = vrot.lane.b32.xlu1 %v2392_v31, %s3231_s16 }
0x1a76   :  { %v2395_v32 = vpop.permute.xlu1 %2394 }
0x1a77   :  { %v2397_v33 = vadd.f32 %v2395_v32, %v2387_v34 }
0x1a79   :  { %3143 = vtanh.f32 %v2397_v33 }
0x1a86   :  { %v3144_v35 = vpop.eup %3143 }
0x1a87   :  { %2400 = vrot.lane.b32.xlu0 %v3144_v35, %s3230_s15 }
0x1af9   :  { %v2401_v38 = vpop.permute.xlu0 %2400 }
0x1afa   :  { %v2403_v39 = vmul.f32 %v3142_v29, %v2401_v38 }
0x1afc   :  { %2416 = vrot.lane.b32.xlu1 %v2403_v39, %s3231_s16 }
0x1b6e   :  { %v2417_v40 = vpop.permute.xlu1 %2416 }
0x1b6f   :  { %3006 = vmatmul.mubr.msk.f32.vlgmr.msra.gmra.mxu1 %vm238_vm1, %v2417_v40 }
0x1c2f   :  { %v2486_v42 = vpop.f32.mrf.mxu1 }
0x1c30   :  { %v2487_v43 = vadd.f32 %v2538_v41, %v2486_v42 }
0x1c31   :  { %v3007_v44 = vpop.f32.mrf.mxu1 }
0x1c32   :  { %2491 = vst.msk [vmem:[%s3873_s9] sm:$0xff] %vm2490_vm2, %v2487_v43 }
0x1c33   :  { %2496 = vsyncpa [#allocation5], 1 }
0x1c34   :  { %2497 = vsyncpa [#allocation7], 1 }

</bundles_post_ra>
